<compile_context>
chip_gen: v7x
topology: tpu7x:2x2x1
jax: 0.10.0
libtpu: 0.0.40
codegen_flags: <defaults>
</compile_context>

<pallas_src>
import functools

import jax
import jax.numpy as jnp
from jax import lax
from jax.experimental import pallas as pl
from jax.experimental.pallas import tpu as pltpu

BN_EPS = 1e-5
LANES = 128      # channel padding target (full lane width)
ROW_PAD = 24     # zero rows above/below the flat a1 (>= W+1, multiple of 8)


# ------------------------- in-kernel helpers --------------------------------

def _bn_scale_bias(y, gamma, beta, eps=BN_EPS):
    # Training-mode BatchNorm over the row axis of a flat (rows, C) activation
    # (rows = N*H*W). Biased variance, like PyTorch BN in training mode.
    mean = jnp.mean(y, axis=0, keepdims=True)
    var = jnp.mean((y - mean) * (y - mean), axis=0, keepdims=True)
    scale = gamma * lax.rsqrt(var + eps)
    bias = beta - mean * scale
    return scale, bias


# ------------------------------ kernel A ------------------------------------
# conv1 (1x1) + bn1 + relu  ->  flat, row-padded activation written to HBM.

def _conv1_bn_relu_kernel(x_ref, w1_ref, g1_ref, b1_ref, a1pad_ref, *, m_rows):
    y1 = jnp.dot(x_ref[...], w1_ref[...], preferred_element_type=jnp.float32)
    s1, b1 = _bn_scale_bias(y1, g1_ref[...], b1_ref[...])
    a1 = jnp.maximum(y1 * s1 + b1, 0.0)
    zeros_pad = jnp.zeros((ROW_PAD, LANES), jnp.float32)
    a1pad_ref[pl.ds(0, ROW_PAD), :] = zeros_pad
    a1pad_ref[pl.ds(ROW_PAD, m_rows), :] = a1
    a1pad_ref[pl.ds(ROW_PAD + m_rows, ROW_PAD), :] = zeros_pad


# ------------------------------ kernel B ------------------------------------
# conv2 (3x3, stride 1, pad 1) + bn2 + relu + conv3 (1x1) + bn3 + add + relu.

def _conv2_bn_conv3_bn_add_relu_kernel(
        a1pad_hbm, w2_ref, w3_ref, g2_ref, b2_ref, g3_ref, b3_ref, res_ref,
        out_ref, win_ref, sem_ref, *, n_img, h, w):
    m_rows = n_img * h * w

    # Issue all 9 shifted-window DMAs (HBM -> VMEM) up front; they overlap
    # with the tap matmuls below.
    for t in range(9):
        oy, ox = t // 3 - 1, t % 3 - 1
        start = ROW_PAD + oy * w + ox          # static python int
        pltpu.make_async_copy(a1pad_hbm.at[pl.ds(start, m_rows)],
                              win_ref.at[t], sem_ref.at[t]).start()

    # Border-validity masks from the flat output row index m = (n*H + y)*W + x.
    row = lax.broadcasted_iota(jnp.int32, (m_rows, LANES), 0)
    ypix = (row // w) % h
    xpix = row % w

    acc = jnp.zeros((m_rows, LANES), jnp.float32)
    for t in range(9):
        oy, ox = t // 3 - 1, t % 3 - 1
        start = ROW_PAD + oy * w + ox
        pltpu.make_async_copy(a1pad_hbm.at[pl.ds(start, m_rows)],
                              win_ref.at[t], sem_ref.at[t]).wait()
        valid = ((ypix + oy >= 0) & (ypix + oy < h) &
                 (xpix + ox >= 0) & (xpix + ox < w))
        tap = jnp.where(valid, win_ref[t], 0.0)
        acc = acc + jnp.dot(tap, w2_ref[t], preferred_element_type=jnp.float32)

    s2, b2 = _bn_scale_bias(acc, g2_ref[...], b2_ref[...])
    a2 = jnp.maximum(acc * s2 + b2, 0.0)

    y3 = jnp.dot(a2, w3_ref[...], preferred_element_type=jnp.float32)
    s3, b3 = _bn_scale_bias(y3, g3_ref[...], b3_ref[...])
    out_ref[...] = jnp.maximum(y3 * s3 + b3 + res_ref[...], 0.0)


# ------------------------------ wrapper --------------------------------------

def _pad2(a, rows, cols):
    return jnp.pad(a.astype(jnp.float32),
                   ((0, rows - a.shape[0]), (0, cols - a.shape[1])))


def bottleneck_forward(x_nchw, params):
    N, cin, H, W = x_nchw.shape
    width = params["w1"].shape[1]
    out_c = params["w3"].shape[1]
    M = N * H * W

    assert M % 8 == 0
    assert ROW_PAD >= W + 1 and ROW_PAD % 8 == 0
    assert max(cin, width, out_c) <= LANES

    x_flat = jnp.transpose(x_nchw, (0, 2, 3, 1)).astype(jnp.float32)
    x_flat = x_flat.reshape(M, cin)
    xp = _pad2(x_flat, M, LANES)                               # lane-dense rows

    w1p = _pad2(params["w1"], LANES, LANES)
    w2p = jnp.pad(params["w2"].astype(jnp.float32).reshape(9, width, width),
                  ((0, 0), (0, LANES - width), (0, LANES - width)))
    w3p = _pad2(params["w3"], LANES, LANES)

    def vec(v):
        return jnp.pad(v.astype(jnp.float32),
                       (0, LANES - v.shape[0])).reshape(1, LANES)

    g1, b1 = vec(params["g1"]), vec(params["be1"])
    g2, b2 = vec(params["g2"]), vec(params["be2"])
    g3, b3 = vec(params["g3"]), vec(params["be3"])

    rows_pad = M + 2 * ROW_PAD
    cparams = pltpu.CompilerParams(dimension_semantics=("arbitrary",),
                                   vmem_limit_bytes=32 * 1024 * 1024)

    # Kernel A: conv1 + bn1 + relu  ->  flat row-padded a1 (one HBM write).
    a1_pad = pl.pallas_call(
        functools.partial(_conv1_bn_relu_kernel, m_rows=M),
        out_shape=jax.ShapeDtypeStruct((rows_pad, LANES), jnp.float32),
        grid=(1,),
        in_specs=[pl.BlockSpec((M, LANES), lambda i: (0, 0)),
                  pl.BlockSpec((LANES, LANES), lambda i: (0, 0)),
                  pl.BlockSpec((1, LANES), lambda i: (0, 0)),
                  pl.BlockSpec((1, LANES), lambda i: (0, 0))],
        out_specs=pl.BlockSpec((rows_pad, LANES), lambda i: (0, 0)),
        compiler_params=cparams,
    )(xp, w1p, g1, b1)

    # Kernel B: 3x3 conv (9 shifted windows) + bn2 + relu + conv3 + bn3
    #           + residual add + relu.
    out_flat = pl.pallas_call(
        functools.partial(_conv2_bn_conv3_bn_add_relu_kernel,
                          n_img=N, h=H, w=W),
        out_shape=jax.ShapeDtypeStruct((M, LANES), jnp.float32),
        grid=(1,),
        in_specs=[pl.BlockSpec(memory_space=pl.ANY),                 # a1_pad
                  pl.BlockSpec((9, LANES, LANES), lambda i: (0, 0, 0)),
                  pl.BlockSpec((LANES, LANES), lambda i: (0, 0)),
                  pl.BlockSpec((1, LANES), lambda i: (0, 0)),
                  pl.BlockSpec((1, LANES), lambda i: (0, 0)),
                  pl.BlockSpec((1, LANES), lambda i: (0, 0)),
                  pl.BlockSpec((1, LANES), lambda i: (0, 0)),
                  pl.BlockSpec((M, LANES), lambda i: (0, 0))],       # residual
        out_specs=pl.BlockSpec((M, LANES), lambda i: (0, 0)),
        scratch_shapes=[pltpu.VMEM((9, M, LANES), jnp.float32),
                        pltpu.SemaphoreType.DMA((9,))],
        compiler_params=cparams,
    )(a1_pad, w2p, w3p, g2, b2, g3, b3, xp)

    out = out_flat[:, :out_c].reshape(N, H, W, out_c)
    return jnp.transpose(out, (0, 3, 1, 2))


# ------------------------------- reference -----------------------------------

def reference_forward(x_nchw, params, eps=BN_EPS):
    x = jnp.transpose(x_nchw, (0, 2, 3, 1)).astype(jnp.float32)

    def bn(y, g, b):
        m = jnp.mean(y, axis=(0, 1, 2))
        v = jnp.var(y, axis=(0, 1, 2))
        return (y - m) / jnp.sqrt(v + eps) * g + b

    y1 = jnp.einsum("nhwc,cd->nhwd", x, params["w1"])
    a1 = jax.nn.relu(bn(y1, params["g1"], params["be1"]))
    y2 = jax.lax.conv_general_dilated(
        a1, params["w2"], window_strides=(1, 1), padding=((1, 1), (1, 1)),
        dimension_numbers=("NHWC", "HWIO", "NHWC"))
    a2 = jax.nn.relu(bn(y2, params["g2"], params["be2"]))
    y3 = jnp.einsum("nhwc,cd->nhwd", a2, params["w3"])
    out = jax.nn.relu(bn(y3, params["g3"], params["be3"]) + x)
    return jnp.transpose(out, (0, 3, 1, 2))


# --------------------------------- main ---------------------------------------

if __name__ == "__main__":
    # Bottleneck(inplanes=16, planes=4): width=4, out channels = planes*4 = 16
    inplanes, planes = 16, 4
    width = planes              # base_width=64, groups=1
    out_c = planes * 4
    N, H, W = 2, 16, 16

    key = jax.random.PRNGKey(0)
    k = jax.random.split(key, 5)
    x = jax.random.normal(k[0], (N, inplanes, H, W), dtype=jnp.float32)

    params = {
        # conv weights stored in matmul / HWIO layout (deterministic init)
        "w1": 0.1 * jax.random.normal(k[1], (inplanes, width), jnp.float32),
        "w2": 0.1 * jax.random.normal(k[2], (3, 3, width, width), jnp.float32),
        "w3": 0.1 * jax.random.normal(k[3], (width, out_c), jnp.float32),
        # BatchNorm2d default affine init: weight=1, bias=0
        "g1": jnp.ones((width,), jnp.float32),
        "be1": jnp.zeros((width,), jnp.float32),
        "g2": jnp.ones((width,), jnp.float32),
        "be2": jnp.zeros((width,), jnp.float32),
        "g3": jnp.ones((out_c,), jnp.float32),
        "be3": jnp.zeros((out_c,), jnp.float32),
    }

    out = jax.block_until_ready(bottleneck_forward(x, params))
    ref = jax.block_until_ready(reference_forward(x, params))

    assert out.shape == (N, out_c, H, W), out.shape
    err = float(jnp.max(jnp.abs(out - ref)))
    assert jnp.allclose(out, ref, atol=1e-3, rtol=1e-3), err

    print("KERNEL_OK")
</pallas_src>

<mosaic_0001>
module attributes {stable_mosaic.version = 11 : i64} {
  func.func @_conv1_bn_relu_kernel(%arg0: i32, %arg1: memref<512x128xf32, #tpu.memory_space<vmem>>, %arg2: memref<128x128xf32, #tpu.memory_space<vmem>>, %arg3: memref<1x128xf32, #tpu.memory_space<vmem>>, %arg4: memref<1x128xf32, #tpu.memory_space<vmem>>, %arg5: memref<560x128xf32, #tpu.memory_space<vmem>>) attributes {dimension_semantics = [#tpu.dimension_semantics<arbitrary>], iteration_bounds = array<i64: 1>, scalar_prefetch = 0 : i64, scratch_operands = 0 : i64, tpu.core_type = #tpu.core_type<tc>, window_params = [{pipeline_mode = #tpu.pipeline_mode<synchronous>, transform_indices = @transform_0, window_bounds = array<i64: 512, 128>}, {pipeline_mode = #tpu.pipeline_mode<synchronous>, transform_indices = @transform_1, window_bounds = array<i64: 128, 128>}, {pipeline_mode = #tpu.pipeline_mode<synchronous>, transform_indices = @transform_2, window_bounds = array<i64: 1, 128>}, {pipeline_mode = #tpu.pipeline_mode<synchronous>, transform_indices = @transform_3, window_bounds = array<i64: 1, 128>}, {pipeline_mode = #tpu.pipeline_mode<synchronous>, transform_indices = @transform_4, window_bounds = array<i64: 560, 128>}]} {
    %c0 = arith.constant 0 : index
    %c0_0 = arith.constant 0 : index
    %0 = vector.load %arg1[%c0, %c0_0] : memref<512x128xf32, #tpu.memory_space<vmem>>, vector<512x128xf32>
    %c0_1 = arith.constant 0 : index
    %c0_2 = arith.constant 0 : index
    %1 = vector.load %arg2[%c0_1, %c0_2] : memref<128x128xf32, #tpu.memory_space<vmem>>, vector<128x128xf32>
    %cst = arith.constant dense<0.000000e+00> : vector<512x128xf32>
    %2 = tpu.matmul %0, %1, %cst {dimension_numbers = #tpu.dot_dimension_numbers<[1], [0], [0], [1], [0, 0, 1, 1], [], []>} : vector<512x128xf32>, vector<128x128xf32>, vector<512x128xf32> -> vector<512x128xf32>
    %c0_3 = arith.constant 0 : index
    %c0_4 = arith.constant 0 : index
    %3 = vector.load %arg3[%c0_3, %c0_4] : memref<1x128xf32, #tpu.memory_space<vmem>>, vector<1x128xf32>
    %c0_5 = arith.constant 0 : index
    %c0_6 = arith.constant 0 : index
    %4 = vector.load %arg4[%c0_5, %c0_6] : memref<1x128xf32, #tpu.memory_space<vmem>>, vector<1x128xf32>
    %cst_7 = arith.constant dense<0.000000e+00> : vector<128xf32>
    %5 = vector.multi_reduction <add>, %2, %cst_7 [0] : vector<512x128xf32> to vector<128xf32>
    %6 = vector.shape_cast %5 : vector<128xf32> to vector<1x128xf32>
    %cst_8 = arith.constant 5.120000e+02 : f32
    %7 = vector.broadcast %cst_8 : f32 to vector<1x128xf32>
    %8 = arith.divf %6, %7 : vector<1x128xf32>
    %9 = vector.broadcast %8 : vector<1x128xf32> to vector<512x128xf32>
    %10 = arith.subf %2, %9 : vector<512x128xf32>
    %11 = vector.broadcast %8 : vector<1x128xf32> to vector<512x128xf32>
    %12 = arith.subf %2, %11 : vector<512x128xf32>
    %13 = arith.mulf %10, %12 : vector<512x128xf32>
    %cst_9 = arith.constant dense<0.000000e+00> : vector<128xf32>
    %14 = vector.multi_reduction <add>, %13, %cst_9 [0] : vector<512x128xf32> to vector<128xf32>
    %15 = vector.shape_cast %14 : vector<128xf32> to vector<1x128xf32>
    %cst_10 = arith.constant 5.120000e+02 : f32
    %16 = vector.broadcast %cst_10 : f32 to vector<1x128xf32>
    %17 = arith.divf %15, %16 : vector<1x128xf32>
    %cst_11 = arith.constant 9.99999974E-6 : f32
    %18 = vector.broadcast %cst_11 : f32 to vector<1x128xf32>
    %19 = arith.addf %17, %18 : vector<1x128xf32>
    %20 = math.rsqrt %19 : vector<1x128xf32>
    %21 = arith.mulf %3, %20 : vector<1x128xf32>
    %22 = arith.mulf %8, %21 : vector<1x128xf32>
    %23 = arith.subf %4, %22 : vector<1x128xf32>
    %24 = vector.broadcast %21 : vector<1x128xf32> to vector<512x128xf32>
    %25 = arith.mulf %2, %24 : vector<512x128xf32>
    %26 = vector.broadcast %23 : vector<1x128xf32> to vector<512x128xf32>
    %27 = arith.addf %25, %26 : vector<512x128xf32>
    %cst_12 = arith.constant 0.000000e+00 : f32
    %28 = vector.broadcast %cst_12 : f32 to vector<512x128xf32>
    %29 = arith.maximumf %27, %28 : vector<512x128xf32>
    %cst_13 = arith.constant 0.000000e+00 : f32
    %30 = vector.broadcast %cst_13 : f32 to vector<24x128xf32>
    %c0_14 = arith.constant 0 : index
    %c0_15 = arith.constant 0 : index
    %31 = vector.load %arg5[%c0_14, %c0_15] : memref<560x128xf32, #tpu.memory_space<vmem>>, vector<24x128xf32>
    tpu.vector_store %arg5[%c0_14, %c0_15], %30 {strides = array<i32>} : memref<560x128xf32, #tpu.memory_space<vmem>>, vector<24x128xf32>,
    %c24 = arith.constant 24 : index
    %c0_16 = arith.constant 0 : index
    %32 = vector.load %arg5[%c24, %c0_16] : memref<560x128xf32, #tpu.memory_space<vmem>>, vector<512x128xf32>
    tpu.vector_store %arg5[%c24, %c0_16], %29 {strides = array<i32>} : memref<560x128xf32, #tpu.memory_space<vmem>>, vector<512x128xf32>,
    %c536 = arith.constant 536 : index
    %c0_17 = arith.constant 0 : index
    %33 = vector.load %arg5[%c536, %c0_17] : memref<560x128xf32, #tpu.memory_space<vmem>>, vector<24x128xf32>
    tpu.vector_store %arg5[%c536, %c0_17], %30 {strides = array<i32>} : memref<560x128xf32, #tpu.memory_space<vmem>>, vector<24x128xf32>,
    return
  }
  func.func @transform_0(%arg0: i32) -> (i32, i32) {
    %c0_i32 = arith.constant 0 : i32
    %c0_i32_0 = arith.constant 0 : i32
    %c0_i32_1 = arith.constant 0 : i32
    return %c0_i32, %c0_i32_0 : i32, i32
  }
  func.func @transform_1(%arg0: i32) -> (i32, i32) {
    %c0_i32 = arith.constant 0 : i32
    %c0_i32_0 = arith.constant 0 : i32
    %c0_i32_1 = arith.constant 0 : i32
    return %c0_i32, %c0_i32_0 : i32, i32
  }
  func.func @transform_2(%arg0: i32) -> (i32, i32) {
    %c0_i32 = arith.constant 0 : i32
    %c0_i32_0 = arith.constant 0 : i32
    %c0_i32_1 = arith.constant 0 : i32
    return %c0_i32, %c0_i32_0 : i32, i32
  }
  func.func @transform_3(%arg0: i32) -> (i32, i32) {
    %c0_i32 = arith.constant 0 : i32
    %c0_i32_0 = arith.constant 0 : i32
    %c0_i32_1 = arith.constant 0 : i32
    return %c0_i32, %c0_i32_0 : i32, i32
  }
  func.func @transform_4(%arg0: i32) -> (i32, i32) {
    %c0_i32 = arith.constant 0 : i32
    %c0_i32_0 = arith.constant 0 : i32
    %c0_i32_1 = arith.constant 0 : i32
    return %c0_i32, %c0_i32_0 : i32, i32
  }
}

</mosaic_0001>

<bundles_post_ra>
// kernel: tpu_custom_call.1
= control target key start
LH: loop header
LB: loop body
LE: loop exit
PB: predicated region body
PF: predicated region fallthrough
CT: control target
= control target key end

     0   :  { %9 = vsyncpa [#allocation3], 0  ;;  %s2394_s0 = inlined_call_operand.hbm [shape: f32[512,128], index: 0, kind: input, shape index: {}]   ;;  %s2395_s1 = inlined_call_operand.hbm [shape: f32[128,128], index: 1, kind: input, shape index: {}]   ;;  %s2396_s2 = inlined_call_operand.vmem [shape: f32[1,128], index: 2, kind: input, shape index: {}]   ;;  %s2397_s3 = inlined_call_operand.vmem [shape: f32[1,128], index: 3, kind: input, shape index: {}]   ;;  %s2398_s4 = inlined_call_operand.hbm [shape: f32[560,128], index: 4, kind: output, shape index: {}]  }
   0x1   :  { %10 = vsyncpa [#allocation6], 0 }
   0x2   :  { %11 = vsyncpa [#allocation4], 0  ;;  %s1415_s15 = smov [#allocation2]   ;;  %s1343_s19 = scalar_lea.hbm %s2394_s0, 8192 }
   0x3   :  { %s17_s16 = sshll.u32 %s1415_s15, 4  ;;  %p1344_p0 = scmp.ne.s32.totalorder %s2394_s0, %s1343_s19  ;;  %s18_s16 = int_to_ptr.vmem [resolvable:$true] %s17_s16 }
   0x4   :  { %p1347_p1 = scmp.lt.u32.totalorder %s1343_s19, %s2394_s0 }
   0x6   :  { %p1349_p2 = pnand %p1347_p1, %p1344_p0 }
   0x8   :  { %1352 = shalt.err (!%p1349_p2)
}
   0x9   :  { %s1353_s24 = scalar_lea.vmem %s18_s16, 8192  ;;  %p1358_p4 = scmp.lt.s32.totalorder %s18_s16, %s18_s16 }
   0xa   :  { %p1354_p3 = scmp.ne.s32.totalorder %s18_s16, %s1353_s24  ;;  %p1359_p5 = scmp.lt.s32.totalorder %s1353_s24, %s1353_s24 }
   0xc   :  { %p1360_p6 = por %p1359_p5, %p1358_p4 }
   0xe   :  { %p1361_p7 = pnand %p1360_p6, %p1354_p3 }
  0x10   :  { %1364 = shalt.err (!%p1361_p7)
}
  0x11   :  { %s1416_s25 = smov 128   ;;  %s1417_s26 = smov 8  }
  0x12   :  { %23 = dma.hbm_to_vmem [thread:$0]  %s2394_s0, 8192, %s18_s16, [#allocation3], %s1416_s25, %s1416_s25, %s1417_s26  }
  0x13   :  { %s1418_s29 = smov [#allocation5]   ;;  %s1365_s7 = scalar_lea.hbm %s2395_s1, 2048 }
  0x14   :  { %s29_s30 = sshll.u32 %s1418_s29, 4  ;;  %p1366_p8 = scmp.ne.s32.totalorder %s2395_s1, %s1365_s7  ;;  %s30_s30 = int_to_ptr.vmem [resolvable:$true] %s29_s30 }
  0x15   :  { %p1369_p9 = scmp.lt.u32.totalorder %s1365_s7, %s2395_s1 }
  0x17   :  { %p1371_p10 = pnand %p1369_p9, %p1366_p8 }
  0x19   :  { %1374 = shalt.err (!%p1371_p10)
}
  0x1a   :  { %s1375_s12 = scalar_lea.vmem %s30_s30, 2048  ;;  %p1380_p12 = scmp.lt.s32.totalorder %s30_s30, %s30_s30 }
  0x1b   :  { %p1376_p11 = scmp.ne.s32.totalorder %s30_s30, %s1375_s12  ;;  %p1381_p13 = scmp.lt.s32.totalorder %s1375_s12, %s1375_s12 }
  0x1d   :  { %p1382_p0 = por %p1381_p13, %p1380_p12 }
  0x1f   :  { %p1383_p1 = pnand %p1382_p0, %p1376_p11 }
  0x21   :  { %1386 = shalt.err (!%p1383_p1)
}
  0x22   :  { %35 = dma.hbm_to_vmem [thread:$0]  %s2395_s1, 2048, %s30_s30, [#allocation6], %s1416_s25, %s1416_s25, %s1417_s26  }
  0x23   :  { %1409 = dma.done.wait [#allocation3], 8192  }
  0x24   :  { %1410 = vsyncadd [#allocation3], 4294959104 }
  0x25   :  { %1411 = dma.done.wait [#allocation6], 2048  }
  0x26   :  { %1412 = vsyncadd [#allocation6], 4294965248  ;;  %v110_v0 = vld [vmem:[#allocation5] sm:$0xff]  ;;  %v111_v1 = vld [vmem:[#allocation5 + $0x8] sm:$0xff] }
  0x27   :  { %v112_v2 = vld [vmem:[#allocation5 + $0x10] sm:$0xff]  ;;  %v1287_v3 = vpack.c.bf16 %v111_v1, %v110_v0  ;;  %v113_v4 = vld [vmem:[#allocation5 + $0x18] sm:$0xff]  ;;  %v114_v6 = vld [vmem:[#allocation5 + $0x20] sm:$0xff] }
  0x28   :  { %v1291_v5 = vpack.c.bf16 %v113_v4, %v112_v2  ;;  %v115_v7 = vld [vmem:[#allocation5 + $0x28] sm:$0xff]  ;;  %v46_v9 = vld [vmem:[#allocation2] sm:$0xff]  ;;  %v116_v10 = vld [vmem:[#allocation5 + $0x30] sm:$0xff] }
  0x29   :  { %1288 = vmatprep.subr.bf16.mxu0 %v1287_v3  ;;  %1319 = vmatprep.subr.bf16.mxu1 %v1287_v3  ;;  %v1295_v8 = vpack.c.bf16 %v115_v7, %v114_v6  ;;  %v117_v11 = vld [vmem:[#allocation5 + $0x38] sm:$0xff]  ;;  %v118_v13 = vld [vmem:[#allocation5 + $0x40] sm:$0xff]  ;;  %v119_v14 = vld [vmem:[#allocation5 + $0x48] sm:$0xff] }
  0x2a   :  { %1290 = vmatpush3.bf16.msra.mxu0 %v1287_v3  ;;  %1327 = vmatpush3.bf16.msra.mxu1 %v1287_v3  ;;  %v1299_v12 = vpack.c.bf16 %v117_v11, %v116_v10  ;;  %v1303_v15 = vpack.c.bf16 %v119_v14, %v118_v13  ;;  %v120_v16 = vld [vmem:[#allocation5 + $0x50] sm:$0xff]  ;;  %v121_v17 = vld [vmem:[#allocation5 + $0x58] sm:$0xff]  ;;  %v78_v18 = vld [vmem:[#allocation2 + $0x100] sm:$0xff] }
  0x2b   :  { %1292 = vmatprep.subr.bf16.mxu0 %v1291_v5  ;;  %1320 = vmatprep.subr.bf16.mxu1 %v1291_v5  ;;  %v1307_v19 = vpack.c.bf16 %v121_v17, %v120_v16  ;;  %v122_v20 = vld [vmem:[#allocation5 + $0x60] sm:$0xff]  ;;  %v123_v21 = vld [vmem:[#allocation5 + $0x68] sm:$0xff]  ;;  %v124_v23 = vld [vmem:[#allocation5 + $0x70] sm:$0xff] }
  0x2c   :  { %1191 = vmatprep.mubr.f32.mxu0 %v46_v9  ;;  %1239 = vmatprep.mubr.f32.mxu1 %v78_v18  ;;  %v1311_v22 = vpack.c.bf16 %v123_v21, %v122_v20  ;;  %v125_v24 = vld [vmem:[#allocation5 + $0x78] sm:$0xff]  ;;  %v47_v26 = vld [vmem:[#allocation2 + $0x8] sm:$0xff]  ;;  %v48_v28 = vld [vmem:[#allocation2 + $0x10] sm:$0xff] }
  0x2d   :  { %v1315_v25 = vpack.c.bf16 %v125_v24, %v124_v23  ;;  %v79_v27 = vld [vmem:[#allocation2 + $0x108] sm:$0xff]  ;;  %v80_v29 = vld [vmem:[#allocation2 + $0x110] sm:$0xff]  ;;  %v49_v30 = vld [vmem:[#allocation2 + $0x18] sm:$0xff] }
  0x2e   :  { %1294 = vmatpush3.bf16.msra.mxu0 %v1291_v5  ;;  %1328 = vmatpush3.bf16.msra.mxu1 %v1291_v5  ;;  %v81_v31 = vld [vmem:[#allocation2 + $0x118] sm:$0xff]  ;;  %v50_v32 = vld [vmem:[#allocation2 + $0x20] sm:$0xff]  ;;  %v51_v34 = vld [vmem:[#allocation2 + $0x28] sm:$0xff] }
  0x2f   :  { %1296 = vmatprep.subr.bf16.mxu0 %v1295_v8  ;;  %1321 = vmatprep.subr.bf16.mxu1 %v1295_v8  ;;  %v82_v33 = vld [vmem:[#allocation2 + $0x120] sm:$0xff]  ;;  %v83_v35 = vld [vmem:[#allocation2 + $0x128] sm:$0xff]  ;;  %v52_v36 = vld [vmem:[#allocation2 + $0x30] sm:$0xff] }
  0x30   :  { %v84_v37 = vld [vmem:[#allocation2 + $0x130] sm:$0xff]  ;;  %v53_v38 = vld [vmem:[#allocation2 + $0x38] sm:$0xff]  ;;  %v54_v40 = vld [vmem:[#allocation2 + $0x40] sm:$0xff] }
  0x31   :  { %v85_v39 = vld [vmem:[#allocation2 + $0x138] sm:$0xff]  ;;  %v86_v41 = vld [vmem:[#allocation2 + $0x140] sm:$0xff]  ;;  %v55_v42 = vld [vmem:[#allocation2 + $0x48] sm:$0xff] }
  0x32   :  { %1298 = vmatpush3.bf16.msra.mxu0 %v1295_v8  ;;  %1329 = vmatpush3.bf16.msra.mxu1 %v1295_v8  ;;  %v87_v43 = vld [vmem:[#allocation2 + $0x148] sm:$0xff]  ;;  %v56_v44 = vld [vmem:[#allocation2 + $0x50] sm:$0xff]  ;;  %v57_v46 = vld [vmem:[#allocation2 + $0x58] sm:$0xff] }
  0x33   :  { %1300 = vmatprep.subr.bf16.mxu0 %v1299_v12  ;;  %1322 = vmatprep.subr.bf16.mxu1 %v1299_v12  ;;  %v88_v45 = vld [vmem:[#allocation2 + $0x150] sm:$0xff]  ;;  %v89_v47 = vld [vmem:[#allocation2 + $0x158] sm:$0xff]  ;;  %v58_v48 = vld [vmem:[#allocation2 + $0x60] sm:$0xff] }
  0x34   :  { %v90_v49 = vld [vmem:[#allocation2 + $0x160] sm:$0xff]  ;;  %v59_v50 = vld [vmem:[#allocation2 + $0x68] sm:$0xff]  ;;  %v60_v52 = vld [vmem:[#allocation2 + $0x70] sm:$0xff] }
  0x35   :  { %v91_v51 = vld [vmem:[#allocation2 + $0x168] sm:$0xff]  ;;  %v92_v53 = vld [vmem:[#allocation2 + $0x170] sm:$0xff]  ;;  %v61_v54 = vld [vmem:[#allocation2 + $0x78] sm:$0xff] }
  0x36   :  { %1302 = vmatpush3.bf16.msra.mxu0 %v1299_v12  ;;  %1330 = vmatpush3.bf16.msra.mxu1 %v1299_v12  ;;  %v93_v55 = vld [vmem:[#allocation2 + $0x178] sm:$0xff]  ;;  %v62_v56 = vld [vmem:[#allocation2 + $0x80] sm:$0xff]  ;;  %v63_v58 = vld [vmem:[#allocation2 + $0x88] sm:$0xff] }
  0x37   :  { %1304 = vmatprep.subr.bf16.mxu0 %v1303_v15  ;;  %1323 = vmatprep.subr.bf16.mxu1 %v1303_v15  ;;  %v94_v57 = vld [vmem:[#allocation2 + $0x180] sm:$0xff]  ;;  %v95_v59 = vld [vmem:[#allocation2 + $0x188] sm:$0xff]  ;;  %v64_v60 = vld [vmem:[#allocation2 + $0x90] sm:$0xff] }
  0x38   :  { %v96_v61 = vld [vmem:[#allocation2 + $0x190] sm:$0xff]  ;;  %v65_v62 = vld [vmem:[#allocation2 + $0x98] sm:$0xff]  ;;  %v66_v0 = vld [vmem:[#allocation2 + $0xa0] sm:$0xff] }
  0x39   :  { %v97_v63 = vld [vmem:[#allocation2 + $0x198] sm:$0xff]  ;;  %v98_v1 = vld [vmem:[#allocation2 + $0x1a0] sm:$0xff]  ;;  %v67_v2 = vld [vmem:[#allocation2 + $0xa8] sm:$0xff] }
  0x3a   :  { %1306 = vmatpush3.bf16.msra.mxu0 %v1303_v15  ;;  %1331 = vmatpush3.bf16.msra.mxu1 %v1303_v15  ;;  %v99_v3 = vld [vmem:[#allocation2 + $0x1a8] sm:$0xff]  ;;  %v68_v4 = vld [vmem:[#allocation2 + $0xb0] sm:$0xff]  ;;  %v69_v6 = vld [vmem:[#allocation2 + $0xb8] sm:$0xff] }
  0x3b   :  { %1308 = vmatprep.subr.bf16.mxu0 %v1307_v19  ;;  %1324 = vmatprep.subr.bf16.mxu1 %v1307_v19  ;;  %v100_v5 = vld [vmem:[#allocation2 + $0x1b0] sm:$0xff]  ;;  %v101_v7 = vld [vmem:[#allocation2 + $0x1b8] sm:$0xff]  ;;  %v70_v8 = vld [vmem:[#allocation2 + $0xc0] sm:$0xff] }
  0x3c   :  { %v102_v9 = vld [vmem:[#allocation2 + $0x1c0] sm:$0xff]  ;;  %v71_v10 = vld [vmem:[#allocation2 + $0xc8] sm:$0xff]  ;;  %v72_v12 = vld [vmem:[#allocation2 + $0xd0] sm:$0xff] }
  0x3d   :  { %v103_v11 = vld [vmem:[#allocation2 + $0x1c8] sm:$0xff]  ;;  %v104_v13 = vld [vmem:[#allocation2 + $0x1d0] sm:$0xff]  ;;  %v73_v14 = vld [vmem:[#allocation2 + $0xd8] sm:$0xff] }
  0x3e   :  { %1310 = vmatpush3.bf16.msra.mxu0 %v1307_v19  ;;  %1332 = vmatpush3.bf16.msra.mxu1 %v1307_v19  ;;  %v105_v15 = vld [vmem:[#allocation2 + $0x1d8] sm:$0xff]  ;;  %v74_v16 = vld [vmem:[#allocation2 + $0xe0] sm:$0xff]  ;;  %v75_v18 = vld [vmem:[#allocation2 + $0xe8] sm:$0xff] }
  0x3f   :  { %1312 = vmatprep.subr.bf16.mxu0 %v1311_v22  ;;  %1325 = vmatprep.subr.bf16.mxu1 %v1311_v22  ;;  %v106_v17 = vld [vmem:[#allocation2 + $0x1e0] sm:$0xff]  ;;  %v107_v19 = vld [vmem:[#allocation2 + $0x1e8] sm:$0xff]  ;;  %v76_v20 = vld [vmem:[#allocation2 + $0xf0] sm:$0xff] }
  0x40   :  { %v108_v21 = vld [vmem:[#allocation2 + $0x1f0] sm:$0xff]  ;;  %v109_v23 = vld [vmem:[#allocation2 + $0x1f8] sm:$0xff] }
  0x42   :  { %1314 = vmatpush3.bf16.msra.mxu0 %v1311_v22  ;;  %1333 = vmatpush3.bf16.msra.mxu1 %v1311_v22  ;;  %v77_v22 = vld [vmem:[#allocation2 + $0xf8] sm:$0xff] }
  0x43   :  { %1316 = vmatprep.subr.bf16.mxu0 %v1315_v25  ;;  %1326 = vmatprep.subr.bf16.mxu1 %v1315_v25 }
  0x46   :  { %1318 = vmatpush3.bf16.msra.mxu0 %v1315_v25  ;;  %1334 = vmatpush3.bf16.msra.mxu1 %v1315_v25 }
  0x49   :  { %1192 = vmatmul.mubr.f32.vlgmr.msra.gmra.mrb[0].mxu0 %v47_v26  ;;  %1240 = vmatmul.mubr.f32.vlgmr.msra.gmra.mrb[0].mxu1 %v79_v27 }
  0x4a   :  { %1194 = vmatprep.mubr.f32.mxu0 %v48_v28  ;;  %1242 = vmatprep.mubr.f32.mxu1 %v80_v29 }
  0x4d   :  { %1195 = vmatmul.mubr.f32.gmra.mrb[2].mxu0 %v49_v30  ;;  %1243 = vmatmul.mubr.f32.gmra.mrb[2].mxu1 %v81_v31 }
  0x4e   :  { %1197 = vmatprep.mubr.f32.mxu0 %v50_v32  ;;  %1245 = vmatprep.mubr.f32.mxu1 %v82_v33 }
  0x51   :  { %1198 = vmatmul.mubr.f32.gmra.mrb[4].mxu0 %v51_v34  ;;  %1246 = vmatmul.mubr.f32.gmra.mrb[4].mxu1 %v83_v35 }
  0x52   :  { %1200 = vmatprep.mubr.f32.mxu0 %v52_v36  ;;  %1248 = vmatprep.mubr.f32.mxu1 %v84_v37 }
  0x55   :  { %1201 = vmatmul.mubr.f32.gmra.mrb[6].mxu0 %v53_v38  ;;  %1249 = vmatmul.mubr.f32.gmra.mrb[6].mxu1 %v85_v39 }
  0x56   :  { %1203 = vmatprep.mubr.f32.mxu0 %v54_v40  ;;  %1251 = vmatprep.mubr.f32.mxu1 %v86_v41 }
  0x59   :  { %1204 = vmatmul.mubr.f32.gmra.mrb[8].mxu0 %v55_v42  ;;  %1252 = vmatmul.mubr.f32.gmra.mrb[8].mxu1 %v87_v43 }
  0x5a   :  { %1206 = vmatprep.mubr.f32.mxu0 %v56_v44  ;;  %1254 = vmatprep.mubr.f32.mxu1 %v88_v45 }
  0x5d   :  { %1207 = vmatmul.mubr.f32.gmra.mrb[10].mxu0 %v57_v46  ;;  %1255 = vmatmul.mubr.f32.gmra.mrb[10].mxu1 %v89_v47 }
  0x5e   :  { %1209 = vmatprep.mubr.f32.mxu0 %v58_v48  ;;  %1257 = vmatprep.mubr.f32.mxu1 %v90_v49 }
  0x61   :  { %1210 = vmatmul.mubr.f32.gmra.mrb[12].mxu0 %v59_v50  ;;  %1258 = vmatmul.mubr.f32.gmra.mrb[12].mxu1 %v91_v51 }
  0x62   :  { %1212 = vmatprep.mubr.f32.mxu0 %v60_v52  ;;  %1260 = vmatprep.mubr.f32.mxu1 %v92_v53 }
  0x65   :  { %1213 = vmatmul.mubr.f32.gmra.mrb[14].mxu0 %v61_v54  ;;  %1261 = vmatmul.mubr.f32.gmra.mrb[14].mxu1 %v93_v55 }
  0x66   :  { %1215 = vmatprep.mubr.f32.mxu0 %v62_v56  ;;  %1263 = vmatprep.mubr.f32.mxu1 %v94_v57 }
  0x69   :  { %1216 = vmatmul.mubr.f32.gmra.mrb[16].mxu0 %v63_v58  ;;  %1264 = vmatmul.mubr.f32.gmra.mrb[16].mxu1 %v95_v59 }
  0x6a   :  { %1218 = vmatprep.mubr.f32.mxu0 %v64_v60  ;;  %1266 = vmatprep.mubr.f32.mxu1 %v96_v61 }
  0x6d   :  { %1219 = vmatmul.mubr.f32.gmra.mrb[18].mxu0 %v65_v62  ;;  %1267 = vmatmul.mubr.f32.gmra.mrb[18].mxu1 %v97_v63 }
  0x6e   :  { %1221 = vmatprep.mubr.f32.mxu0 %v66_v0  ;;  %1269 = vmatprep.mubr.f32.mxu1 %v98_v1 }
  0x71   :  { %1222 = vmatmul.mubr.f32.gmra.mrb[20].mxu0 %v67_v2  ;;  %1270 = vmatmul.mubr.f32.gmra.mrb[20].mxu1 %v99_v3 }
  0x72   :  { %1224 = vmatprep.mubr.f32.mxu0 %v68_v4  ;;  %1272 = vmatprep.mubr.f32.mxu1 %v100_v5 }
  0x75   :  { %1225 = vmatmul.mubr.f32.gmra.mrb[22].mxu0 %v69_v6  ;;  %1273 = vmatmul.mubr.f32.gmra.mrb[22].mxu1 %v101_v7 }
  0x76   :  { %1227 = vmatprep.mubr.f32.mxu0 %v70_v8  ;;  %1275 = vmatprep.mubr.f32.mxu1 %v102_v9 }
  0x79   :  { %1228 = vmatmul.mubr.f32.gmra.mrb[24].mxu0 %v71_v10  ;;  %1276 = vmatmul.mubr.f32.gmra.mrb[24].mxu1 %v103_v11 }
  0x7a   :  { %1230 = vmatprep.mubr.f32.mxu0 %v72_v12  ;;  %1278 = vmatprep.mubr.f32.mxu1 %v104_v13 }
  0x7d   :  { %1231 = vmatmul.mubr.f32.gmra.mrb[26].mxu0 %v73_v14  ;;  %1279 = vmatmul.mubr.f32.gmra.mrb[26].mxu1 %v105_v15 }
  0x7e   :  { %1233 = vmatprep.mubr.f32.mxu0 %v74_v16  ;;  %1281 = vmatprep.mubr.f32.mxu1 %v106_v17 }
  0x81   :  { %1234 = vmatmul.mubr.f32.gmra.mrb[28].mxu0 %v75_v18  ;;  %1282 = vmatmul.mubr.f32.gmra.mrb[28].mxu1 %v107_v19 }
  0x82   :  { %1236 = vmatprep.mubr.f32.mxu0 %v76_v20  ;;  %1284 = vmatprep.mubr.f32.mxu1 %v108_v21 }
  0x85   :  { %1237 = vmatmul.mubr.f32.gmra.mrb[30].mxu0 %v77_v22  ;;  %1285 = vmatmul.mubr.f32.gmra.mrb[30].mxu1 %v109_v23 }
 0x11c   :  { %v1476_v24 = vpop.f32.mrb[0].mxu0  ;;  %v1478_v25 = vpop.f32.mrb[0].mxu1 }
 0x11d   :  { %v1480_v26 = vpop.f32.mrb[1].mxu0  ;;  %v1482_v27 = vpop.f32.mrb[1].mxu1 }
 0x11e   :  { %v513_v28 = vadd.f32 %v1476_v24, %v1480_v26 }
 0x120   :  { %v1486_v29 = vpop.f32.mrb[2].mxu0  ;;  %v1488_v30 = vpop.f32.mrb[2].mxu1 }
 0x121   :  { %2445 = vst [vmem:[#allocation11_spill] sm:$0xff] %v1486_v29  ;;  %v1490_v31 = vpop.f32.mrb[3].mxu0  ;;  %v1492_v32 = vpop.f32.mrb[3].mxu1 }
 0x122   :  { %2446 = vst [vmem:[#allocation12_spill] sm:$0xff] %v1490_v31  ;;  %v514_v33 = vadd.f32 %v513_v28, %v1490_v31 }
 0x124   :  { %v1495_v34 = vpop.f32.mrb[4].mxu0  ;;  %v515_v35 = vadd.f32 %v1486_v29, %v514_v33  ;;  %v1498_v36 = vpop.f32.mrb[4].mxu1 }
 0x125   :  { %v1500_v37 = vpop.f32.mrb[5].mxu0  ;;  %v1502_v38 = vpop.f32.mrb[5].mxu1 }
 0x126   :  { %2447 = vst [vmem:[#allocation13_spill] sm:$0xff] %v1500_v37  ;;  %v516_v39 = vadd.f32 %v515_v35, %v1500_v37 }
 0x128   :  { %v1505_v40 = vpop.f32.mrb[6].mxu0  ;;  %v517_v41 = vadd.f32 %v1495_v34, %v516_v39  ;;  %v1508_v42 = vpop.f32.mrb[6].mxu1 }
 0x129   :  { %v1510_v43 = vpop.f32.mrb[7].mxu0  ;;  %v1512_v44 = vpop.f32.mrb[7].mxu1 }
 0x12a   :  { %v518_v45 = vadd.f32 %v517_v41, %v1510_v43 }
 0x12c   :  { %v1515_v46 = vpop.f32.mrb[8].mxu0  ;;  %v519_v47 = vadd.f32 %v1505_v40, %v518_v45  ;;  %v1518_v48 = vpop.f32.mrb[8].mxu1 }
 0x12d   :  { %v1520_v49 = vpop.f32.mrb[9].mxu0  ;;  %v1522_v50 = vpop.f32.mrb[9].mxu1 }
 0x12e   :  { %v520_v51 = vadd.f32 %v519_v47, %v1520_v49 }
 0x130   :  { %v1525_v52 = vpop.f32.mrb[10].mxu0  ;;  %v521_v53 = vadd.f32 %v1515_v46, %v520_v51  ;;  %v1528_v54 = vpop.f32.mrb[10].mxu1 }
 0x131   :  { %v1530_v55 = vpop.f32.mrb[11].mxu0  ;;  %v1532_v56 = vpop.f32.mrb[11].mxu1 }
 0x132   :  { %v522_v57 = vadd.f32 %v521_v53, %v1530_v55 }
 0x134   :  { %v1535_v58 = vpop.f32.mrb[12].mxu0  ;;  %v523_v59 = vadd.f32 %v1525_v52, %v522_v57  ;;  %v1538_v60 = vpop.f32.mrb[12].mxu1 }
 0x135   :  { %v1540_v61 = vpop.f32.mrb[13].mxu0  ;;  %v1542_v62 = vpop.f32.mrb[13].mxu1 }
 0x136   :  { %v524_v63 = vadd.f32 %v523_v59, %v1540_v61 }
 0x138   :  { %v1545_v0 = vpop.f32.mrb[14].mxu0  ;;  %v525_v1 = vadd.f32 %v1535_v58, %v524_v63  ;;  %v1548_v2 = vpop.f32.mrb[14].mxu1 }
 0x139   :  { %2448 = vst [vmem:[#allocation14_spill] sm:$0xff] %v1545_v0  ;;  %v1550_v3 = vpop.f32.mrb[15].mxu0  ;;  %v1552_v4 = vpop.f32.mrb[15].mxu1 }
 0x13a   :  { %v526_v5 = vadd.f32 %v525_v1, %v1550_v3 }
 0x13c   :  { %v1555_v6 = vpop.f32.mrb[16].mxu0  ;;  %v527_v7 = vadd.f32 %v1545_v0, %v526_v5  ;;  %v1558_v8 = vpop.f32.mrb[16].mxu1 }
 0x13d   :  { %2449 = vst [vmem:[#allocation15_spill] sm:$0xff] %v1555_v6  ;;  %2450 = vst [vmem:[#allocation16_spill] sm:$0xff] %v1558_v8  ;;  %v1560_v9 = vpop.f32.mrb[17].mxu0  ;;  %v1562_v10 = vpop.f32.mrb[17].mxu1 }
 0x13e   :  { %2451 = vst [vmem:[#allocation17_spill] sm:$0xff] %v1560_v9  ;;  %v528_v11 = vadd.f32 %v527_v7, %v1560_v9 }
 0x140   :  { %v1565_v12 = vpop.f32.mrb[18].mxu0  ;;  %v529_v13 = vadd.f32 %v1555_v6, %v528_v11  ;;  %v1568_v14 = vpop.f32.mrb[18].mxu1 }
 0x141   :  { %2452 = vst [vmem:[#allocation18_spill] sm:$0xff] %v1565_v12  ;;  %2453 = vst [vmem:[#allocation19_spill] sm:$0xff] %v1568_v14  ;;  %v1570_v15 = vpop.f32.mrb[19].mxu0  ;;  %v1572_v16 = vpop.f32.mrb[19].mxu1 }
 0x142   :  { %2454 = vst [vmem:[#allocation20_spill] sm:$0xff] %v1570_v15  ;;  %2455 = vst [vmem:[#allocation21_spill] sm:$0xff] %v1572_v16  ;;  %v530_v17 = vadd.f32 %v529_v13, %v1570_v15 }
 0x144   :  { %v1575_v18 = vpop.f32.mrb[20].mxu0  ;;  %v531_v19 = vadd.f32 %v1565_v12, %v530_v17  ;;  %v1578_v20 = vpop.f32.mrb[20].mxu1 }
 0x145   :  { %2456 = vst [vmem:[#allocation22_spill] sm:$0xff] %v1575_v18  ;;  %2457 = vst [vmem:[#allocation23_spill] sm:$0xff] %v1578_v20  ;;  %v1580_v21 = vpop.f32.mrb[21].mxu0  ;;  %v1582_v22 = vpop.f32.mrb[21].mxu1 }
 0x146   :  { %2458 = vst [vmem:[#allocation24_spill] sm:$0xff] %v1580_v21  ;;  %2459 = vst [vmem:[#allocation25_spill] sm:$0xff] %v1582_v22  ;;  %v532_v23 = vadd.f32 %v531_v19, %v1580_v21 }
 0x148   :  { %v1585_v28 = vpop.f32.mrb[22].mxu0  ;;  %v533_v33 = vadd.f32 %v1575_v18, %v532_v23  ;;  %v1588_v35 = vpop.f32.mrb[22].mxu1 }
 0x149   :  { %2460 = vst [vmem:[#allocation26_spill] sm:$0xff] %v1585_v28  ;;  %2461 = vst [vmem:[#allocation27_spill] sm:$0xff] %v1588_v35  ;;  %v1590_v39 = vpop.f32.mrb[23].mxu0  ;;  %v1592_v41 = vpop.f32.mrb[23].mxu1 }
 0x14a   :  { %2462 = vst [vmem:[#allocation28_spill] sm:$0xff] %v1590_v39  ;;  %2463 = vst [vmem:[#allocation29_spill] sm:$0xff] %v1592_v41  ;;  %v534_v45 = vadd.f32 %v533_v33, %v1590_v39 }
 0x14c   :  { %v1595_v47 = vpop.f32.mrb[24].mxu0  ;;  %v535_v51 = vadd.f32 %v1585_v28, %v534_v45  ;;  %v1598_v53 = vpop.f32.mrb[24].mxu1 }
 0x14d   :  { %2464 = vst [vmem:[#allocation30_spill] sm:$0xff] %v1595_v47  ;;  %2465 = vst [vmem:[#allocation31_spill] sm:$0xff] %v1598_v53  ;;  %v1600_v57 = vpop.f32.mrb[25].mxu0  ;;  %v1602_v59 = vpop.f32.mrb[25].mxu1 }
 0x14e   :  { %2466 = vst [vmem:[#allocation32_spill] sm:$0xff] %v1600_v57  ;;  %2467 = vst [vmem:[#allocation33_spill] sm:$0xff] %v1602_v59  ;;  %v536_v63 = vadd.f32 %v535_v51, %v1600_v57 }
 0x150   :  { %v1605_v1 = vpop.f32.mrb[26].mxu0  ;;  %v537_v5 = vadd.f32 %v1595_v47, %v536_v63  ;;  %v1608_v7 = vpop.f32.mrb[26].mxu1 }
 0x151   :  { %2468 = vst [vmem:[#allocation34_spill] sm:$0xff] %v1605_v1  ;;  %2469 = vst [vmem:[#allocation35_spill] sm:$0xff] %v1608_v7  ;;  %v1610_v11 = vpop.f32.mrb[27].mxu0  ;;  %v1612_v13 = vpop.f32.mrb[27].mxu1 }
 0x152   :  { %2470 = vst [vmem:[#allocation36_spill] sm:$0xff] %v1610_v11  ;;  %2471 = vst [vmem:[#allocation37_spill] sm:$0xff] %v1612_v13  ;;  %v538_v17 = vadd.f32 %v537_v5, %v1610_v11 }
 0x154   :  { %v1615_v19 = vpop.f32.mrb[28].mxu0  ;;  %v539_v23 = vadd.f32 %v1605_v1, %v538_v17  ;;  %v1618_v33 = vpop.f32.mrb[28].mxu1 }
 0x155   :  { %2472 = vst [vmem:[#allocation38_spill] sm:$0xff] %v1615_v19  ;;  %2473 = vst [vmem:[#allocation39_spill] sm:$0xff] %v1618_v33  ;;  %v1620_v45 = vpop.f32.mrb[29].mxu0  ;;  %v1622_v51 = vpop.f32.mrb[29].mxu1 }
 0x156   :  { %2474 = vst [vmem:[#allocation40_spill] sm:$0xff] %v1620_v45  ;;  %2475 = vst [vmem:[#allocation41_spill] sm:$0xff] %v1622_v51  ;;  %v540_v63 = vadd.f32 %v539_v23, %v1620_v45 }
 0x158   :  { %v1625_v47 = vpop.f32.mrb[30].mxu0  ;;  %v541_v57 = vadd.f32 %v1615_v19, %v540_v63  ;;  %v1628_v28 = vpop.f32.mrb[30].mxu1 }
 0x159   :  { %v1630_v39 = vpop.f32.mrb[31].mxu0  ;;  %v1632_v5 = vpop.f32.mrb[31].mxu1 }
 0x15a   :  { %v542_v17 = vadd.f32 %v541_v57, %v1630_v39 }
 0x15c   :  { %v543_v1 = vadd.f32 %v1625_v47, %v542_v17 }
 0x15e   :  { %v544_v11 = vadd.f32 %v543_v1, %v1482_v27 }
 0x160   :  { %v545_v18 = vadd.f32 %v1478_v25, %v544_v11 }
 0x162   :  { %v546_v23 = vadd.f32 %v545_v18, %v1492_v32 }
 0x164   :  { %v547_v45 = vadd.f32 %v1488_v30, %v546_v23 }
 0x166   :  { %v548_v63 = vadd.f32 %v547_v45, %v1502_v38 }
 0x168   :  { %v549_v19 = vadd.f32 %v1498_v36, %v548_v63 }
 0x16a   :  { %v550_v21 = vadd.f32 %v549_v19, %v1512_v44 }
 0x16c   :  { %v551_v12 = vadd.f32 %v1508_v42, %v550_v21 }
 0x16e   :  { %v552_v57 = vadd.f32 %v551_v12, %v1522_v50 }
 0x170   :  { %v553_v17 = vadd.f32 %v1518_v48, %v552_v57 }
 0x172   :  { %v554_v1 = vadd.f32 %v553_v17, %v1532_v56 }
 0x174   :  { %v555_v11 = vadd.f32 %v1528_v54, %v554_v1 }
 0x176   :  { %v556_v18 = vadd.f32 %v555_v11, %v1542_v62 }
 0x178   :  { %v557_v23 = vadd.f32 %v1538_v60, %v556_v18 }
 0x17a   :  { %v558_v45 = vadd.f32 %v557_v23, %v1552_v4 }
 0x17c   :  { %v559_v63 = vadd.f32 %v1548_v2, %v558_v45 }
 0x17e   :  { %v560_v19 = vadd.f32 %v559_v63, %v1562_v10 }
 0x180   :  { %v561_v21 = vadd.f32 %v1558_v8, %v560_v19 }
 0x182   :  { %v562_v12 = vadd.f32 %v561_v21, %v1572_v16 }
 0x184   :  { %v563_v57 = vadd.f32 %v1568_v14, %v562_v12 }
 0x186   :  { %v564_v17 = vadd.f32 %v563_v57, %v1582_v22 }
 0x188   :  { %v565_v1 = vadd.f32 %v1578_v20, %v564_v17 }
 0x18a   :  { %v566_v11 = vadd.f32 %v565_v1, %v1592_v41 }
 0x18c   :  { %v567_v18 = vadd.f32 %v1588_v35, %v566_v11 }
 0x18e   :  { %v568_v23 = vadd.f32 %v567_v18, %v1602_v59 }
 0x190   :  { %v569_v45 = vadd.f32 %v1598_v53, %v568_v23 }
 0x192   :  { %v570_v63 = vadd.f32 %v569_v45, %v1612_v13 }
 0x194   :  { %v571_v19 = vadd.f32 %v1608_v7, %v570_v63 }
 0x196   :  { %v572_v21 = vadd.f32 %v571_v19, %v1622_v51 }
 0x198   :  { %v573_v12 = vadd.f32 %v1618_v33, %v572_v21 }
 0x19a   :  { %v574_v57 = vadd.f32 %v573_v12, %v1632_v5 }
 0x19c   :  { %v575_v17 = vadd.f32 %v1628_v28, %v574_v57 }
 0x19e   :  { %v576_v20 = vrot.slane %v575_v17, 4 }
 0x1a0   :  { %v577_v1 = vadd.f32 %v576_v20, %v575_v17 }
 0x1a2   :  { %v578_v41 = vrot.slane %v577_v1, 2 }
 0x1a4   :  { %v579_v11 = vadd.f32 %v578_v41, %v577_v1 }
 0x1a6   :  { %v580_v35 = vrot.slane %v579_v11, 1 }
 0x1a8   :  { %v581_v18 = vadd.f32 %v580_v35, %v579_v11 }
 0x1aa   :  { %v1668_v59 = vmul.f32 0.001953125, %v581_v18 }
 0x1ac   :  { %v584_v23 = vsub.f32 %v1480_v26, %v1668_v59  ;;  %v585_v45 = vsub.f32 %v1476_v24, %v1668_v59  ;;  %v586_v63 = vsub.f32 %v1490_v31, %v1668_v59  ;;  %v587_v20 = vsub.f32 %v1486_v29, %v1668_v59 }
 0x1ad   :  { %v588_v41 = vsub.f32 %v1500_v37, %v1668_v59  ;;  %v589_v57 = vsub.f32 %v1495_v34, %v1668_v59  ;;  %v590_v11 = vsub.f32 %v1510_v43, %v1668_v59  ;;  %v592_v37 = vsub.f32 %v1520_v49, %v1668_v59 }
 0x1ae   :  { %v648_v19 = vmul.f32 %v584_v23, %v584_v23  ;;  %v649_v21 = vmul.f32 %v585_v45, %v585_v45  ;;  %v650_v35 = vmul.f32 %v586_v63, %v586_v63  ;;  %v651_v17 = vmul.f32 %v587_v20, %v587_v20 }
 0x1af   :  { %v652_v18 = vmul.f32 %v588_v41, %v588_v41  ;;  %v591_v23 = vsub.f32 %v1505_v40, %v1668_v59  ;;  %v653_v45 = vmul.f32 %v589_v57, %v589_v57  ;;  %v654_v63 = vmul.f32 %v590_v11, %v590_v11 }
 0x1b0   :  { %v712_v12 = vadd.f32 %v649_v21, %v648_v19  ;;  %v593_v21 = vsub.f32 %v1515_v46, %v1668_v59  ;;  %v656_v41 = vmul.f32 %v592_v37, %v592_v37 }
 0x1b1   :  { %v655_v20 = vmul.f32 %v591_v23, %v591_v23 }
 0x1b2   :  { %v713_v1 = vadd.f32 %v712_v12, %v650_v35  ;;  %v594_v12 = vsub.f32 %v1530_v55, %v1668_v59  ;;  %v657_v57 = vmul.f32 %v593_v21, %v593_v21 }
 0x1b4   :  { %v714_v31 = vadd.f32 %v713_v1, %v651_v17  ;;  %v595_v1 = vsub.f32 %v1525_v52, %v1668_v59  ;;  %v658_v11 = vmul.f32 %v594_v12, %v594_v12 }
 0x1b6   :  { %v715_v29 = vadd.f32 %v714_v31, %v652_v18  ;;  %v596_v18 = vsub.f32 %v1540_v61, %v1668_v59  ;;  %v659_v23 = vmul.f32 %v595_v1, %v595_v1 }
 0x1b8   :  { %v716_v19 = vadd.f32 %v715_v29, %v653_v45  ;;  %v597_v45 = vsub.f32 %v1535_v58, %v1668_v59  ;;  %v660_v37 = vmul.f32 %v596_v18, %v596_v18 }
 0x1ba   :  { %v717_v35 = vadd.f32 %v716_v19, %v654_v63  ;;  %v598_v19 = vsub.f32 %v1550_v3, %v1668_v59  ;;  %v661_v21 = vmul.f32 %v597_v45, %v597_v45 }
 0x1bc   :  { %v718_v17 = vadd.f32 %v717_v35, %v655_v20  ;;  %v599_v35 = vsub.f32 %v1545_v0, %v1668_v59  ;;  %v662_v12 = vmul.f32 %v598_v19, %v598_v19 }
 0x1be   :  { %v719_v31 = vadd.f32 %v718_v17, %v656_v41  ;;  %v600_v17 = vsub.f32 %v1560_v9, %v1668_v59  ;;  %v663_v1 = vmul.f32 %v599_v35, %v599_v35 }
 0x1c0   :  { %v720_v29 = vadd.f32 %v719_v31, %v657_v57  ;;  %v601_v31 = vsub.f32 %v1555_v6, %v1668_v59  ;;  %v664_v18 = vmul.f32 %v600_v17, %v600_v17 }
 0x1c2   :  { %v721_v63 = vadd.f32 %v720_v29, %v658_v11  ;;  %v602_v29 = vsub.f32 %v1570_v15, %v1668_v59  ;;  %v665_v45 = vmul.f32 %v601_v31, %v601_v31 }
 0x1c4   :  { %v722_v20 = vadd.f32 %v721_v63, %v659_v23  ;;  %v2476_v63 = vld [vmem:[#allocation18_spill] sm:$0xff]  ;;  %v666_v19 = vmul.f32 %v602_v29, %v602_v29 }
 0x1c5   :  { %v603_v0 = vsub.f32 %v2476_v63, %v1668_v59 }
 0x1c6   :  { %v723_v41 = vadd.f32 %v722_v20, %v660_v37  ;;  %v2477_v20 = vld [vmem:[#allocation24_spill] sm:$0xff] }
 0x1c7   :  { %v604_v9 = vsub.f32 %v2477_v20, %v1668_v59  ;;  %v667_v35 = vmul.f32 %v603_v0, %v603_v0 }
 0x1c8   :  { %v724_v57 = vadd.f32 %v723_v41, %v661_v21  ;;  %v2478_v41 = vld [vmem:[#allocation22_spill] sm:$0xff] }
 0x1c9   :  { %v605_v6 = vsub.f32 %v2478_v41, %v1668_v59  ;;  %v668_v17 = vmul.f32 %v604_v9, %v604_v9 }
 0x1ca   :  { %v725_v11 = vadd.f32 %v724_v57, %v662_v12  ;;  %v2479_v57 = vld [vmem:[#allocation28_spill] sm:$0xff] }
 0x1cb   :  { %v606_v15 = vsub.f32 %v2479_v57, %v1668_v59  ;;  %v669_v31 = vmul.f32 %v605_v6, %v605_v6 }
 0x1cc   :  { %v726_v23 = vadd.f32 %v725_v11, %v663_v1  ;;  %v2480_v11 = vld [vmem:[#allocation26_spill] sm:$0xff] }
 0x1cd   :  { %v607_v63 = vsub.f32 %v2480_v11, %v1668_v59  ;;  %v670_v29 = vmul.f32 %v606_v15, %v606_v15 }
 0x1ce   :  { %v727_v37 = vadd.f32 %v726_v23, %v664_v18  ;;  %v2481_v23 = vld [vmem:[#allocation32_spill] sm:$0xff] }
 0x1cf   :  { %v608_v20 = vsub.f32 %v2481_v23, %v1668_v59  ;;  %v671_v0 = vmul.f32 %v607_v63, %v607_v63 }
 0x1d0   :  { %v728_v21 = vadd.f32 %v727_v37, %v665_v45  ;;  %v2482_v37 = vld [vmem:[#allocation30_spill] sm:$0xff] }
 0x1d1   :  { %v609_v41 = vsub.f32 %v2482_v37, %v1668_v59  ;;  %v672_v9 = vmul.f32 %v608_v20, %v608_v20 }
 0x1d2   :  { %v729_v12 = vadd.f32 %v728_v21, %v666_v19  ;;  %v2483_v21 = vld [vmem:[#allocation36_spill] sm:$0xff] }
 0x1d3   :  { %v610_v57 = vsub.f32 %v2483_v21, %v1668_v59  ;;  %v673_v6 = vmul.f32 %v609_v41, %v609_v41 }
 0x1d4   :  { %v730_v1 = vadd.f32 %v729_v12, %v667_v35  ;;  %v2484_v12 = vld [vmem:[#allocation34_spill] sm:$0xff] }
 0x1d5   :  { %v611_v11 = vsub.f32 %v2484_v12, %v1668_v59  ;;  %v674_v15 = vmul.f32 %v610_v57, %v610_v57 }
 0x1d6   :  { %v731_v18 = vadd.f32 %v730_v1, %v668_v17  ;;  %v2485_v1 = vld [vmem:[#allocation40_spill] sm:$0xff] }
 0x1d7   :  { %v612_v23 = vsub.f32 %v2485_v1, %v1668_v59  ;;  %v675_v63 = vmul.f32 %v611_v11, %v611_v11 }
 0x1d8   :  { %v732_v45 = vadd.f32 %v731_v18, %v669_v31  ;;  %v2486_v18 = vld [vmem:[#allocation38_spill] sm:$0xff] }
 0x1d9   :  { %v613_v37 = vsub.f32 %v2486_v18, %v1668_v59  ;;  %v676_v20 = vmul.f32 %v612_v23, %v612_v23 }
 0x1da   :  { %v733_v19 = vadd.f32 %v732_v45, %v670_v29  ;;  %v614_v45 = vsub.f32 %v1630_v39, %v1668_v59 }
 0x1db   :  { %v677_v41 = vmul.f32 %v613_v37, %v613_v37 }
 0x1dc   :  { %v734_v35 = vadd.f32 %v733_v19, %v671_v0  ;;  %v615_v19 = vsub.f32 %v1625_v47, %v1668_v59  ;;  %v678_v57 = vmul.f32 %v614_v45, %v614_v45 }
 0x1de   :  { %v735_v17 = vadd.f32 %v734_v35, %v672_v9  ;;  %v616_v35 = vsub.f32 %v1482_v27, %v1668_v59  ;;  %v679_v11 = vmul.f32 %v615_v19, %v615_v19 }
 0x1e0   :  { %v736_v31 = vadd.f32 %v735_v17, %v673_v6  ;;  %v617_v17 = vsub.f32 %v1478_v25, %v1668_v59  ;;  %v680_v23 = vmul.f32 %v616_v35, %v616_v35 }
 0x1e2   :  { %v737_v29 = vadd.f32 %v736_v31, %v674_v15  ;;  %v618_v31 = vsub.f32 %v1492_v32, %v1668_v59  ;;  %v681_v37 = vmul.f32 %v617_v17, %v617_v17 }
 0x1e4   :  { %v738_v0 = vadd.f32 %v737_v29, %v675_v63  ;;  %v619_v29 = vsub.f32 %v1488_v30, %v1668_v59  ;;  %v682_v45 = vmul.f32 %v618_v31, %v618_v31 }
 0x1e6   :  { %v739_v9 = vadd.f32 %v738_v0, %v676_v20  ;;  %v620_v0 = vsub.f32 %v1502_v38, %v1668_v59  ;;  %v683_v19 = vmul.f32 %v619_v29, %v619_v29 }
 0x1e8   :  { %v740_v6 = vadd.f32 %v739_v9, %v677_v41  ;;  %v621_v9 = vsub.f32 %v1498_v36, %v1668_v59  ;;  %v684_v35 = vmul.f32 %v620_v0, %v620_v0 }
 0x1ea   :  { %v741_v15 = vadd.f32 %v740_v6, %v678_v57  ;;  %v622_v6 = vsub.f32 %v1512_v44, %v1668_v59  ;;  %v685_v17 = vmul.f32 %v621_v9, %v621_v9 }
 0x1ec   :  { %v742_v63 = vadd.f32 %v741_v15, %v679_v11  ;;  %v623_v15 = vsub.f32 %v1508_v42, %v1668_v59  ;;  %v686_v31 = vmul.f32 %v622_v6, %v622_v6  ;;  %v628_v6 = vsub.f32 %v1542_v62, %v1668_v59 }
 0x1ee   :  { %v743_v20 = vadd.f32 %v742_v63, %v680_v23  ;;  %v624_v63 = vsub.f32 %v1522_v50, %v1668_v59  ;;  %v687_v29 = vmul.f32 %v623_v15, %v623_v15 }
 0x1f0   :  { %v744_v41 = vadd.f32 %v743_v20, %v681_v37  ;;  %v625_v20 = vsub.f32 %v1518_v48, %v1668_v59  ;;  %v688_v0 = vmul.f32 %v624_v63, %v624_v63 }
 0x1f2   :  { %v745_v57 = vadd.f32 %v744_v41, %v682_v45  ;;  %v626_v41 = vsub.f32 %v1532_v56, %v1668_v59  ;;  %v689_v9 = vmul.f32 %v625_v20, %v625_v20  ;;  %v692_v20 = vmul.f32 %v628_v6, %v628_v6 }
 0x1f4   :  { %v746_v11 = vadd.f32 %v745_v57, %v683_v19  ;;  %v627_v57 = vsub.f32 %v1528_v54, %v1668_v59  ;;  %v690_v15 = vmul.f32 %v626_v41, %v626_v41 }
 0x1f6   :  { %v747_v23 = vadd.f32 %v746_v11, %v684_v35  ;;  %v1419_v11 = vmov 0.0   ;;  %v691_v63 = vmul.f32 %v627_v57, %v627_v57 }
 0x1f7   :  { %991 = vst [vmem:[#allocation7] sm:$0xff] %v1419_v11  ;;  %992 = vst [vmem:[#allocation7 + $0x8] sm:$0xff] %v1419_v11 }
 0x1f8   :  { %v748_v37 = vadd.f32 %v747_v23, %v685_v17  ;;  %993 = vst [vmem:[#allocation7 + $0x10] sm:$0xff] %v1419_v11  ;;  %1058 = vst [vmem:[#allocation7 + $0x218] sm:$0xff] %v1419_v11  ;;  %v629_v23 = vsub.f32 %v1538_v60, %v1668_v59 }
 0x1f9   :  { %1059 = vst [vmem:[#allocation7 + $0x220] sm:$0xff] %v1419_v11  ;;  %1060 = vst [vmem:[#allocation7 + $0x228] sm:$0xff] %v1419_v11  ;;  %v632_v11 = vsub.f32 %v1562_v10, %v1668_v59 }
 0x1fa   :  { %v749_v45 = vadd.f32 %v748_v37, %v686_v31  ;;  %v630_v37 = vsub.f32 %v1552_v4, %v1668_v59 }
 0x1fb   :  { %v696_v6 = vmul.f32 %v632_v11, %v632_v11 }
 0x1fc   :  { %v750_v19 = vadd.f32 %v749_v45, %v687_v29  ;;  %v631_v45 = vsub.f32 %v1548_v2, %v1668_v59  ;;  %v694_v41 = vmul.f32 %v630_v37, %v630_v37 }
 0x1fe   :  { %v751_v35 = vadd.f32 %v750_v19, %v688_v0  ;;  %v693_v0 = vmul.f32 %v629_v23, %v629_v23  ;;  %v695_v57 = vmul.f32 %v631_v45, %v631_v45 }
 0x200   :  { %v752_v17 = vadd.f32 %v751_v35, %v689_v9  ;;  %v633_v35 = vsub.f32 %v1558_v8, %v1668_v59 }
 0x202   :  { %v753_v31 = vadd.f32 %v752_v17, %v690_v15  ;;  %v634_v17 = vsub.f32 %v1572_v16, %v1668_v59  ;;  %v697_v23 = vmul.f32 %v633_v35, %v633_v35 }
 0x204   :  { %v754_v29 = vadd.f32 %v753_v31, %v691_v63  ;;  %v635_v31 = vsub.f32 %v1568_v14, %v1668_v59  ;;  %v698_v37 = vmul.f32 %v634_v17, %v634_v17 }
 0x206   :  { %v755_v19 = vadd.f32 %v754_v29, %v692_v20  ;;  %v636_v29 = vsub.f32 %v1582_v22, %v1668_v59  ;;  %v699_v45 = vmul.f32 %v635_v31, %v635_v31 }
 0x208   :  { %v756_v9 = vadd.f32 %v755_v19, %v693_v0  ;;  %v2487_v19 = vld [vmem:[#allocation23_spill] sm:$0xff]  ;;  %v700_v11 = vmul.f32 %v636_v29, %v636_v29 }
 0x209   :  { %v637_v8 = vsub.f32 %v2487_v19, %v1668_v59 }
 0x20a   :  { %v757_v15 = vadd.f32 %v756_v9, %v694_v41  ;;  %v2488_v9 = vld [vmem:[#allocation29_spill] sm:$0xff] }
 0x20b   :  { %v638_v16 = vsub.f32 %v2488_v9, %v1668_v59  ;;  %v701_v35 = vmul.f32 %v637_v8, %v637_v8 }
 0x20c   :  { %v758_v63 = vadd.f32 %v757_v15, %v695_v57  ;;  %v2489_v15 = vld [vmem:[#allocation27_spill] sm:$0xff] }
 0x20d   :  { %v639_v14 = vsub.f32 %v2489_v15, %v1668_v59  ;;  %v702_v17 = vmul.f32 %v638_v16, %v638_v16 }
 0x20e   :  { %v759_v20 = vadd.f32 %v758_v63, %v696_v6  ;;  %v2490_v63 = vld [vmem:[#allocation33_spill] sm:$0xff] }
 0x20f   :  { %v640_v22 = vsub.f32 %v2490_v63, %v1668_v59  ;;  %v703_v31 = vmul.f32 %v639_v14, %v639_v14 }
 0x210   :  { %v760_v0 = vadd.f32 %v759_v20, %v697_v23  ;;  %v641_v20 = vsub.f32 %v1598_v53, %v1668_v59 }
 0x211   :  { %v704_v29 = vmul.f32 %v640_v22, %v640_v22 }
 0x212   :  { %v761_v41 = vadd.f32 %v760_v0, %v698_v37  ;;  %v642_v0 = vsub.f32 %v1612_v13, %v1668_v59  ;;  %v705_v8 = vmul.f32 %v641_v20, %v641_v20 }
 0x214   :  { %v762_v57 = vadd.f32 %v761_v41, %v699_v45  ;;  %v643_v41 = vsub.f32 %v1608_v7, %v1668_v59  ;;  %v706_v16 = vmul.f32 %v642_v0, %v642_v0 }
 0x216   :  { %v763_v6 = vadd.f32 %v762_v57, %v700_v11  ;;  %v644_v57 = vsub.f32 %v1622_v51, %v1668_v59  ;;  %v707_v14 = vmul.f32 %v643_v41, %v643_v41 }
 0x218   :  { %v764_v23 = vadd.f32 %v763_v6, %v701_v35  ;;  %v645_v6 = vsub.f32 %v1618_v33, %v1668_v59  ;;  %v708_v22 = vmul.f32 %v644_v57, %v644_v57  ;;  %v788_v57 = vlaneseq }
 0x21a   :  { %v765_v37 = vadd.f32 %v764_v23, %v702_v17  ;;  %v646_v23 = vsub.f32 %v1632_v5, %v1668_v59  ;;  %v709_v20 = vmul.f32 %v645_v6, %v645_v6  ;;  %v511_v6 = vld [vmem:[%s2396_s2] sm:$0x1]  ;;  %s1420_s2 = smov [#allocation7]  }
 0x21c   :  { %v766_v45 = vadd.f32 %v765_v37, %v703_v31  ;;  %v647_v37 = vsub.f32 %v1628_v28, %v1668_v59 }
 0x21e   :  { %v767_v11 = vadd.f32 %v766_v45, %v704_v29  ;;  %v710_v45 = vmul.f32 %v646_v23, %v646_v23  ;;  %v711_v51 = vmul.f32 %v647_v37, %v647_v37  ;;  %v2491_v37 = vld [vmem:[#allocation12_spill] sm:$0xff] }
 0x220   :  { %v768_v35 = vadd.f32 %v767_v11, %v705_v8 }
 0x222   :  { %v769_v17 = vadd.f32 %v768_v35, %v706_v16 }
 0x224   :  { %v770_v31 = vadd.f32 %v769_v17, %v707_v14  ;;  %v789_v14 = vshrl.u32 %v788_v57, 7 }
 0x226   :  { %v771_v29 = vadd.f32 %v770_v31, %v708_v22  ;;  %v790_v17 = vsub.s32 0, %v789_v14 }
 0x228   :  { %v772_v7 = vadd.f32 %v771_v29, %v709_v20 }
 0x22a   :  { %v773_v0 = vadd.f32 %v772_v7, %v710_v45  ;;  %v512_v7 = vld [vmem:[%s2397_s3] sm:$0x1]  ;;  %s1066_s3 = sshll.u32 %s1420_s2, 4  ;;  %s1067_s3 = int_to_ptr.vmem [resolvable:$true] %s1066_s3 }
 0x22b   :  { %v2493_v45 = vld [vmem:[#allocation13_spill] sm:$0xff]  ;;  %s1387_s17 = scalar_lea.vmem %s1067_s3, 8960  ;;  %p1392_p3 = scmp.lt.s32.totalorder %s1067_s3, %s1067_s3 }
 0x22c   :  { %v774_v8 = vadd.f32 %v773_v0, %v711_v51  ;;  %p1388_p2 = scmp.ne.s32.totalorder %s1067_s3, %s1387_s17  ;;  %p1393_p4 = scmp.lt.s32.totalorder %s1387_s17, %s1387_s17 }
 0x22e   :  { %v775_v11 = vrot.slane %v774_v8, 4  ;;  %p1394_p5 = por %p1393_p4, %p1392_p3 }
 0x230   :  { %v776_v13 = vadd.f32 %v775_v11, %v774_v8  ;;  %p1395_p6 = pnand %p1394_p5, %p1388_p2 }
 0x232   :  { %v777_v33 = vrot.slane %v776_v13, 2 }
 0x234   :  { %v778_v41 = vadd.f32 %v777_v33, %v776_v13 }
 0x236   :  { %v779_v16 = vrot.slane %v778_v41, 1 }
 0x238   :  { %v780_v35 = vadd.f32 %v779_v16, %v778_v41 }
 0x23a   :  { %v781_v53 = vmul.f32 0.001953125, %v780_v35 }
 0x23c   :  { %v782_v63 = vadd.f32 1e-05, %v781_v53 }
 0x23e   :  { %1341 = vrsqrt.f32 %v782_v63 }
 0x248   :  { %v1342_v23 = vpop.eup %1341 }
 0x249   :  { %v784_v22 = vmul.f32 %v1342_v23, %v511_v6  ;;  %v2497_v6 = vld [vmem:[#allocation20_spill] sm:$0xff] }
 0x24b   :  { %v785_v13 = vmul.f32 %v784_v22, %v1668_v59  ;;  %v1805_v33 = vrot.slane %v784_v22, %v790_v17  ;;  %v2492_v59 = vld [vmem:[#allocation11_spill] sm:$0xff]  ;;  %v2499_v22 = vld [vmem:[#allocation24_spill] sm:$0xff] }
 0x24d   :  { %v786_v51 = vsub.f32 %v512_v7, %v785_v13  ;;  %v855_v53 = vmul.f32 %v1805_v33, %v1632_v5  ;;  %v1811_v63 = vmul.f32 %v1805_v33, %v1480_v26  ;;  %v1815_v31 = vmul.f32 %v1476_v24, %v1805_v33  ;;  %v2500_v13 = vld [vmem:[#allocation22_spill] sm:$0xff] }
 0x24e   :  { %v1819_v20 = vmul.f32 %v1805_v33, %v2491_v37  ;;  %v1823_v29 = vmul.f32 %v2492_v59, %v1805_v33  ;;  %v1827_v0 = vmul.f32 %v1805_v33, %v2493_v45  ;;  %v1831_v26 = vmul.f32 %v1495_v34, %v1805_v33  ;;  %v2502_v59 = vld [vmem:[#allocation26_spill] sm:$0xff] }
 0x24f   :  { %v1833_v5 = vrot.slane %v786_v51, %v790_v17  ;;  %v1837_v24 = vmul.f32 %v1805_v33, %v1510_v43  ;;  %v1841_v8 = vmul.f32 %v1505_v40, %v1805_v33  ;;  %v1845_v11 = vmul.f32 %v1805_v33, %v1520_v49  ;;  %v2498_v17 = vld [vmem:[#allocation18_spill] sm:$0xff] }
 0x250   :  { %v1849_v41 = vmul.f32 %v1515_v46, %v1805_v33  ;;  %v1853_v34 = vmul.f32 %v1805_v33, %v1530_v55  ;;  %v1857_v43 = vmul.f32 %v1525_v52, %v1805_v33  ;;  %v1861_v40 = vmul.f32 %v1805_v33, %v1540_v61  ;;  %v2494_v55 = vld [vmem:[#allocation14_spill] sm:$0xff]  ;;  %v2495_v52 = vld [vmem:[#allocation17_spill] sm:$0xff]  ;;  %v2496_v61 = vld [vmem:[#allocation15_spill] sm:$0xff] }
 0x251   :  { %v925_v16 = vadd.f32 %v1833_v5, %v855_v53  ;;  %v1866_v49 = vmul.f32 %v1535_v58, %v1805_v33  ;;  %v1870_v46 = vmul.f32 %v1805_v33, %v1550_v3  ;;  %v1874_v35 = vmul.f32 %v2494_v55, %v1805_v33  ;;  %v2501_v53 = vld [vmem:[#allocation28_spill] sm:$0xff] }
 0x252   :  { %v1878_v57 = vmul.f32 %v1805_v33, %v2495_v52  ;;  %v1882_v14 = vmul.f32 %v2496_v61, %v1805_v33  ;;  %v1886_v58 = vmul.f32 %v1805_v33, %v2497_v6  ;;  %v1890_v3 = vmul.f32 %v2498_v17, %v1805_v33  ;;  %v2503_v55 = vld [vmem:[#allocation32_spill] sm:$0xff] }
 0x253   :  { %v989_v23 = vmax.f32 %v925_v16, 0.0  ;;  %v1894_v7 = vmul.f32 %v1805_v33, %v2499_v22  ;;  %v1898_v51 = vmul.f32 %v2500_v13, %v1805_v33  ;;  %v1902_v37 = vmul.f32 %v1805_v33, %v2501_v53  ;;  %v2504_v16 = vld [vmem:[#allocation30_spill] sm:$0xff] }
 0x254   :  { %v1906_v45 = vmul.f32 %v2502_v59, %v1805_v33  ;;  %v1910_v52 = vmul.f32 %v1805_v33, %v2503_v55  ;;  %v1914_v61 = vmul.f32 %v2504_v16, %v1805_v33  ;;  %v1918_v6 = vmul.f32 %v1805_v33, %v2483_v21  ;;  %v2506_v59 = vld [vmem:[#allocation21_spill] sm:$0xff]  ;;  %v2508_v55 = vld [vmem:[#allocation19_spill] sm:$0xff] }
 0x255   :  { %1056 = vst [vmem:[#allocation7 + $0x208] sm:$0xff] %v989_v23  ;;  %v1922_v17 = vmul.f32 %v2484_v12, %v1805_v33  ;;  %v1926_v22 = vmul.f32 %v1805_v33, %v2485_v1  ;;  %v1930_v13 = vmul.f32 %v2486_v18, %v1805_v33  ;;  %v1934_v53 = vmul.f32 %v1805_v33, %v1630_v39  ;;  %v2505_v23 = vld [vmem:[#allocation16_spill] sm:$0xff]  ;;  %v2510_v16 = vld [vmem:[#allocation25_spill] sm:$0xff] }
 0x256   :  { %v1938_v21 = vmul.f32 %v1625_v47, %v1805_v33  ;;  %v1942_v12 = vmul.f32 %v1805_v33, %v1482_v27  ;;  %v1946_v1 = vmul.f32 %v1478_v25, %v1805_v33  ;;  %v1950_v18 = vmul.f32 %v1805_v33, %v1492_v32 }
 0x257   :  { %v1954_v39 = vmul.f32 %v1488_v30, %v1805_v33  ;;  %v1958_v47 = vmul.f32 %v1805_v33, %v1502_v38  ;;  %v1962_v27 = vmul.f32 %v1498_v36, %v1805_v33  ;;  %v1966_v25 = vmul.f32 %v1805_v33, %v1512_v44 }
 0x258   :  { %v1970_v32 = vmul.f32 %v1508_v42, %v1805_v33  ;;  %v1974_v30 = vmul.f32 %v1805_v33, %v1522_v50  ;;  %v1978_v38 = vmul.f32 %v1518_v48, %v1805_v33  ;;  %v1982_v36 = vmul.f32 %v1805_v33, %v1532_v56 }
 0x259   :  { %v1986_v44 = vmul.f32 %v1528_v54, %v1805_v33  ;;  %v1990_v42 = vmul.f32 %v1805_v33, %v1542_v62  ;;  %v1994_v50 = vmul.f32 %v1538_v60, %v1805_v33  ;;  %v1998_v48 = vmul.f32 %v1805_v33, %v1552_v4 }
 0x25a   :  { %v2002_v56 = vmul.f32 %v1548_v2, %v1805_v33  ;;  %v2006_v54 = vmul.f32 %v1805_v33, %v1562_v10  ;;  %v2010_v62 = vmul.f32 %v2505_v23, %v1805_v33  ;;  %v2014_v60 = vmul.f32 %v1805_v33, %v2506_v59 }
 0x25b   :  { %v2018_v4 = vmul.f32 %v2508_v55, %v1805_v33  ;;  %v2022_v2 = vmul.f32 %v1805_v33, %v2510_v16  ;;  %v2026_v10 = vmul.f32 %v2487_v19, %v1805_v33  ;;  %v2030_v23 = vmul.f32 %v1805_v33, %v2488_v9 }
 0x25c   :  { %2507 = vst [vmem:[#allocation36_spill] sm:$0xff] %v2014_v60  ;;  %v2034_v59 = vmul.f32 %v2489_v15, %v1805_v33  ;;  %v2515_v60 = vld [vmem:[#allocation33_spill] sm:$0xff] }
 0x25d   :  { %2509 = vst [vmem:[#allocation34_spill] sm:$0xff] %v2018_v4  ;;  %2511 = vst [vmem:[#allocation40_spill] sm:$0xff] %v2022_v2  ;;  %v2038_v55 = vmul.f32 %v1805_v33, %v2515_v60  ;;  %v2516_v4 = vld [vmem:[#allocation31_spill] sm:$0xff]  ;;  %v2517_v2 = vld [vmem:[#allocation37_spill] sm:$0xff] }
 0x25e   :  { %2512 = vst [vmem:[#allocation38_spill] sm:$0xff] %v2026_v10  ;;  %2513 = vst [vmem:[#allocation23_spill] sm:$0xff] %v2030_v23  ;;  %v2042_v16 = vmul.f32 %v2516_v4, %v1805_v33  ;;  %v2046_v19 = vmul.f32 %v1805_v33, %v2517_v2  ;;  %v2518_v10 = vld [vmem:[#allocation35_spill] sm:$0xff]  ;;  %v2519_v23 = vld [vmem:[#allocation41_spill] sm:$0xff]  ;;  %v2062_v4 = vmul.f32 %v1628_v28, %v1805_v33 }
 0x25f   :  { %2514 = vst [vmem:[#allocation29_spill] sm:$0xff] %v2034_v59  ;;  %v2050_v9 = vmul.f32 %v2518_v10, %v1805_v33  ;;  %v2054_v15 = vmul.f32 %v1805_v33, %v2519_v23  ;;  %v2520_v59 = vld [vmem:[#allocation39_spill] sm:$0xff]  ;;  %v2066_v2 = vadd.f32 %v1833_v5, %v1811_v63  ;;  %v2070_v10 = vadd.f32 %v1833_v5, %v1815_v31 }
 0x260   :  { %v2058_v60 = vmul.f32 %v2520_v59, %v1805_v33  ;;  %v2074_v23 = vadd.f32 %v1833_v5, %v1819_v20  ;;  %v2078_v59 = vadd.f32 %v1833_v5, %v1823_v29  ;;  %v2082_v28 = vadd.f32 %v1833_v5, %v1827_v0 }
 0x261   :  { %v2086_v33 = vadd.f32 %v1833_v5, %v1831_v26  ;;  %v2090_v63 = vadd.f32 %v1833_v5, %v1837_v24  ;;  %v2094_v31 = vadd.f32 %v1833_v5, %v1841_v8  ;;  %v2098_v20 = vadd.f32 %v1833_v5, %v1845_v11 }
 0x262   :  { %v2102_v29 = vadd.f32 %v1833_v5, %v1849_v41  ;;  %v2106_v0 = vadd.f32 %v1833_v5, %v1853_v34  ;;  %v2110_v26 = vadd.f32 %v1833_v5, %v1857_v43  ;;  %v2114_v24 = vadd.f32 %v1833_v5, %v1861_v40 }
 0x263   :  { %v2118_v8 = vadd.f32 %v1833_v5, %v1866_v49  ;;  %v2122_v11 = vadd.f32 %v1833_v5, %v1870_v46  ;;  %v2126_v41 = vadd.f32 %v1833_v5, %v1874_v35  ;;  %v2130_v34 = vadd.f32 %v1833_v5, %v1878_v57 }
 0x264   :  { %v2134_v43 = vadd.f32 %v1833_v5, %v1882_v14  ;;  %v2138_v40 = vadd.f32 %v1833_v5, %v1886_v58  ;;  %v2142_v49 = vadd.f32 %v1833_v5, %v1890_v3  ;;  %v2146_v46 = vadd.f32 %v1833_v5, %v1894_v7 }
 0x265   :  { %v2150_v35 = vadd.f32 %v1833_v5, %v1898_v51  ;;  %v2154_v57 = vadd.f32 %v1833_v5, %v1902_v37  ;;  %v2158_v14 = vadd.f32 %v1833_v5, %v1906_v45  ;;  %v2162_v58 = vadd.f32 %v1833_v5, %v1910_v52 }
 0x266   :  { %v2166_v3 = vadd.f32 %v1833_v5, %v1914_v61  ;;  %v2170_v7 = vadd.f32 %v1833_v5, %v1918_v6  ;;  %v2174_v51 = vadd.f32 %v1833_v5, %v1922_v17  ;;  %v2178_v37 = vadd.f32 %v1833_v5, %v1926_v22 }
 0x267   :  { %v2182_v45 = vadd.f32 %v1833_v5, %v1930_v13  ;;  %v2186_v52 = vadd.f32 %v1833_v5, %v1934_v53  ;;  %v2190_v61 = vadd.f32 %v1833_v5, %v1938_v21  ;;  %v2194_v6 = vadd.f32 %v1833_v5, %v1942_v12 }
 0x268   :  { %v2198_v17 = vadd.f32 %v1833_v5, %v1946_v1  ;;  %v2202_v22 = vadd.f32 %v1833_v5, %v1950_v18  ;;  %v2206_v13 = vadd.f32 %v1833_v5, %v1954_v39  ;;  %v2210_v53 = vadd.f32 %v1833_v5, %v1958_v47 }
 0x269   :  { %v2214_v21 = vadd.f32 %v1833_v5, %v1962_v27  ;;  %v2218_v12 = vadd.f32 %v1833_v5, %v1966_v25  ;;  %v2222_v1 = vadd.f32 %v1833_v5, %v1970_v32  ;;  %v2226_v18 = vadd.f32 %v1833_v5, %v1974_v30 }
 0x26a   :  { %v2230_v39 = vadd.f32 %v1833_v5, %v1978_v38  ;;  %v2234_v47 = vadd.f32 %v1833_v5, %v1982_v36  ;;  %v2238_v27 = vadd.f32 %v1833_v5, %v1986_v44  ;;  %v2242_v25 = vadd.f32 %v1833_v5, %v1990_v42  ;;  %v2526_v42 = vld [vmem:[#allocation36_spill] sm:$0xff] }
 0x26b   :  { %v2246_v32 = vadd.f32 %v1833_v5, %v1994_v50  ;;  %v2250_v30 = vadd.f32 %v1833_v5, %v1998_v48  ;;  %v2254_v38 = vadd.f32 %v1833_v5, %v2002_v56  ;;  %v2258_v36 = vadd.f32 %v1833_v5, %v2006_v54 }
 0x26c   :  { %v2262_v44 = vadd.f32 %v1833_v5, %v2010_v62  ;;  %v2266_v50 = vadd.f32 %v1833_v5, %v2526_v42 }
 0x26d   :  { %2521 = vst [vmem:[#allocation27_spill] sm:$0xff] %v2246_v32  ;;  %2522 = vst [vmem:[#allocation12_spill] sm:$0xff] %v2250_v30  ;;  %v2527_v32 = vld [vmem:[#allocation34_spill] sm:$0xff]  ;;  %v2528_v30 = vld [vmem:[#allocation40_spill] sm:$0xff] }
 0x26e   :  { %2523 = vst [vmem:[#allocation11_spill] sm:$0xff] %v2254_v38  ;;  %2524 = vst [vmem:[#allocation13_spill] sm:$0xff] %v2258_v36  ;;  %v2270_v48 = vadd.f32 %v1833_v5, %v2527_v32  ;;  %v2274_v56 = vadd.f32 %v1833_v5, %v2528_v30  ;;  %v2529_v38 = vld [vmem:[#allocation38_spill] sm:$0xff]  ;;  %v2530_v36 = vld [vmem:[#allocation23_spill] sm:$0xff]  ;;  %v2290_v32 = vadd.f32 %v1833_v5, %v2038_v55 }
 0x26f   :  { %2525 = vst [vmem:[#allocation14_spill] sm:$0xff] %v2262_v44  ;;  %v2278_v54 = vadd.f32 %v1833_v5, %v2529_v38  ;;  %v2282_v62 = vadd.f32 %v1833_v5, %v2530_v36  ;;  %v2531_v44 = vld [vmem:[#allocation29_spill] sm:$0xff]  ;;  %v2294_v30 = vadd.f32 %v1833_v5, %v2042_v16  ;;  %v2298_v38 = vadd.f32 %v1833_v5, %v2046_v19 }
 0x270   :  { %v2286_v42 = vadd.f32 %v1833_v5, %v2531_v44  ;;  %v2302_v36 = vadd.f32 %v1833_v5, %v2050_v9  ;;  %v2306_v44 = vadd.f32 %v1833_v5, %v2054_v15  ;;  %v2310_v55 = vadd.f32 %v1833_v5, %v2058_v60 }
 0x271   :  { %2532 = vst [vmem:[#allocation17_spill] sm:$0xff] %v2294_v30  ;;  %2533 = vst [vmem:[#allocation15_spill] sm:$0xff] %v2298_v38  ;;  %v2314_v16 = vadd.f32 %v1833_v5, %v2062_v4  ;;  %v927_v30 = vmax.f32 %v2066_v2, 0.0  ;;  %v928_v19 = vmax.f32 %v2070_v10, 0.0  ;;  %v929_v38 = vmax.f32 %v2074_v23, 0.0 }
 0x272   :  { %2534 = vst [vmem:[#allocation20_spill] sm:$0xff] %v2302_v36  ;;  %2535 = vst [vmem:[#allocation18_spill] sm:$0xff] %v2306_v44  ;;  %v930_v9 = vmax.f32 %v2078_v59, 0.0  ;;  %v931_v36 = vmax.f32 %v2082_v28, 0.0  ;;  %v932_v15 = vmax.f32 %v2086_v33, 0.0  ;;  %v933_v44 = vmax.f32 %v2090_v63, 0.0 }
 0x273   :  { %2536 = vst [vmem:[#allocation24_spill] sm:$0xff] %v2310_v55  ;;  %v934_v60 = vmax.f32 %v2094_v31, 0.0  ;;  %v935_v55 = vmax.f32 %v2098_v20, 0.0  ;;  %994 = vst [vmem:[#allocation7 + $0x18] sm:$0xff] %v927_v30  ;;  %v936_v5 = vmax.f32 %v2102_v29, 0.0  ;;  %v937_v4 = vmax.f32 %v2106_v0, 0.0 }
 0x274   :  { %v938_v2 = vmax.f32 %v2110_v26, 0.0  ;;  %v939_v10 = vmax.f32 %v2114_v24, 0.0  ;;  %995 = vst [vmem:[#allocation7 + $0x20] sm:$0xff] %v928_v19  ;;  %996 = vst [vmem:[#allocation7 + $0x28] sm:$0xff] %v929_v38  ;;  %v940_v23 = vmax.f32 %v2118_v8, 0.0  ;;  %v941_v59 = vmax.f32 %v2122_v11, 0.0 }
 0x275   :  { %997 = vst [vmem:[#allocation7 + $0x30] sm:$0xff] %v930_v9  ;;  %998 = vst [vmem:[#allocation7 + $0x38] sm:$0xff] %v931_v36  ;;  %v942_v28 = vmax.f32 %v2126_v41, 0.0  ;;  %v943_v33 = vmax.f32 %v2130_v34, 0.0  ;;  %v944_v63 = vmax.f32 %v2134_v43, 0.0  ;;  %v945_v31 = vmax.f32 %v2138_v40, 0.0 }
 0x276   :  { %999 = vst [vmem:[#allocation7 + $0x40] sm:$0xff] %v932_v15  ;;  %1000 = vst [vmem:[#allocation7 + $0x48] sm:$0xff] %v933_v44  ;;  %v946_v20 = vmax.f32 %v2142_v49, 0.0  ;;  %v947_v29 = vmax.f32 %v2146_v46, 0.0  ;;  %v948_v0 = vmax.f32 %v2150_v35, 0.0  ;;  %v949_v26 = vmax.f32 %v2154_v57, 0.0 }
 0x277   :  { %1001 = vst [vmem:[#allocation7 + $0x50] sm:$0xff] %v934_v60  ;;  %1002 = vst [vmem:[#allocation7 + $0x58] sm:$0xff] %v935_v55  ;;  %v950_v24 = vmax.f32 %v2158_v14, 0.0  ;;  %v951_v8 = vmax.f32 %v2162_v58, 0.0  ;;  %v952_v11 = vmax.f32 %v2166_v3, 0.0  ;;  %v953_v41 = vmax.f32 %v2170_v7, 0.0 }
 0x278   :  { %1003 = vst [vmem:[#allocation7 + $0x60] sm:$0xff] %v936_v5  ;;  %1004 = vst [vmem:[#allocation7 + $0x68] sm:$0xff] %v937_v4  ;;  %v954_v34 = vmax.f32 %v2174_v51, 0.0  ;;  %v955_v43 = vmax.f32 %v2178_v37, 0.0  ;;  %v956_v40 = vmax.f32 %v2182_v45, 0.0  ;;  %v957_v49 = vmax.f32 %v2186_v52, 0.0 }
 0x279   :  { %1005 = vst [vmem:[#allocation7 + $0x70] sm:$0xff] %v938_v2  ;;  %1006 = vst [vmem:[#allocation7 + $0x78] sm:$0xff] %v939_v10  ;;  %v958_v46 = vmax.f32 %v2190_v61, 0.0  ;;  %v959_v35 = vmax.f32 %v2194_v6, 0.0  ;;  %v960_v57 = vmax.f32 %v2198_v17, 0.0  ;;  %v961_v14 = vmax.f32 %v2202_v22, 0.0 }
 0x27a   :  { %1007 = vst [vmem:[#allocation7 + $0x80] sm:$0xff] %v940_v23  ;;  %1008 = vst [vmem:[#allocation7 + $0x88] sm:$0xff] %v941_v59  ;;  %v962_v58 = vmax.f32 %v2206_v13, 0.0  ;;  %v963_v3 = vmax.f32 %v2210_v53, 0.0  ;;  %v964_v7 = vmax.f32 %v2214_v21, 0.0  ;;  %v965_v51 = vmax.f32 %v2218_v12, 0.0 }
 0x27b   :  { %1009 = vst [vmem:[#allocation7 + $0x90] sm:$0xff] %v942_v28  ;;  %1010 = vst [vmem:[#allocation7 + $0x98] sm:$0xff] %v943_v33  ;;  %v966_v37 = vmax.f32 %v2222_v1, 0.0  ;;  %v967_v45 = vmax.f32 %v2226_v18, 0.0  ;;  %v968_v52 = vmax.f32 %v2230_v39, 0.0  ;;  %v969_v61 = vmax.f32 %v2234_v47, 0.0 }
 0x27c   :  { %1011 = vst [vmem:[#allocation7 + $0xa0] sm:$0xff] %v944_v63  ;;  %1012 = vst [vmem:[#allocation7 + $0xa8] sm:$0xff] %v945_v31  ;;  %v970_v6 = vmax.f32 %v2238_v27, 0.0  ;;  %v971_v17 = vmax.f32 %v2242_v25, 0.0  ;;  %v2537_v22 = vld [vmem:[#allocation27_spill] sm:$0xff]  ;;  %v2538_v53 = vld [vmem:[#allocation12_spill] sm:$0xff] }
 0x27d   :  { %1013 = vst [vmem:[#allocation7 + $0xb0] sm:$0xff] %v946_v20  ;;  %1014 = vst [vmem:[#allocation7 + $0xb8] sm:$0xff] %v947_v29  ;;  %v972_v13 = vmax.f32 %v2537_v22, 0.0  ;;  %v973_v21 = vmax.f32 %v2538_v53, 0.0  ;;  %v2539_v12 = vld [vmem:[#allocation11_spill] sm:$0xff]  ;;  %v2540_v18 = vld [vmem:[#allocation13_spill] sm:$0xff] }
 0x27e   :  { %1015 = vst [vmem:[#allocation7 + $0xc0] sm:$0xff] %v948_v0  ;;  %1016 = vst [vmem:[#allocation7 + $0xc8] sm:$0xff] %v949_v26  ;;  %v974_v1 = vmax.f32 %v2539_v12, 0.0  ;;  %v975_v30 = vmax.f32 %v2540_v18, 0.0  ;;  %v2541_v39 = vld [vmem:[#allocation14_spill] sm:$0xff]  ;;  %v977_v27 = vmax.f32 %v2266_v50, 0.0 }
 0x27f   :  { %1017 = vst [vmem:[#allocation7 + $0xd0] sm:$0xff] %v950_v24  ;;  %1018 = vst [vmem:[#allocation7 + $0xd8] sm:$0xff] %v951_v8  ;;  %v976_v47 = vmax.f32 %v2541_v39, 0.0  ;;  %v978_v25 = vmax.f32 %v2270_v48, 0.0  ;;  %v979_v38 = vmax.f32 %v2274_v56, 0.0  ;;  %v980_v36 = vmax.f32 %v2278_v54, 0.0 }
 0x280   :  { %1019 = vst [vmem:[#allocation7 + $0xe0] sm:$0xff] %v952_v11  ;;  %1020 = vst [vmem:[#allocation7 + $0xe8] sm:$0xff] %v953_v41  ;;  %v981_v44 = vmax.f32 %v2282_v62, 0.0  ;;  %v982_v55 = vmax.f32 %v2286_v42, 0.0  ;;  %v983_v19 = vmax.f32 %v2290_v32, 0.0  ;;  %v2542_v50 = vld [vmem:[#allocation17_spill] sm:$0xff] }
 0x281   :  { %1021 = vst [vmem:[#allocation7 + $0xf0] sm:$0xff] %v954_v34  ;;  %1022 = vst [vmem:[#allocation7 + $0xf8] sm:$0xff] %v955_v43  ;;  %v984_v48 = vmax.f32 %v2542_v50, 0.0  ;;  %v2543_v56 = vld [vmem:[#allocation15_spill] sm:$0xff]  ;;  %v2544_v15 = vld [vmem:[#allocation20_spill] sm:$0xff]  ;;  %v990_v42 = vmax.f32 %v2314_v16, 0.0 }
 0x282   :  { %1023 = vst [vmem:[#allocation7 + $0x100] sm:$0xff] %v956_v40  ;;  %1024 = vst [vmem:[#allocation7 + $0x108] sm:$0xff] %v957_v49  ;;  %v985_v9 = vmax.f32 %v2543_v56, 0.0  ;;  %v986_v60 = vmax.f32 %v2544_v15, 0.0  ;;  %v2545_v5 = vld [vmem:[#allocation18_spill] sm:$0xff]  ;;  %v2546_v54 = vld [vmem:[#allocation24_spill] sm:$0xff] }
 0x283   :  { %1025 = vst [vmem:[#allocation7 + $0x110] sm:$0xff] %v958_v46  ;;  %1026 = vst [vmem:[#allocation7 + $0x118] sm:$0xff] %v959_v35  ;;  %v987_v4 = vmax.f32 %v2545_v5, 0.0  ;;  %v988_v62 = vmax.f32 %v2546_v54, 0.0 }
 0x284   :  { %1027 = vst [vmem:[#allocation7 + $0x120] sm:$0xff] %v960_v57  ;;  %1028 = vst [vmem:[#allocation7 + $0x128] sm:$0xff] %v961_v14 }
 0x285   :  { %1029 = vst [vmem:[#allocation7 + $0x130] sm:$0xff] %v962_v58  ;;  %1030 = vst [vmem:[#allocation7 + $0x138] sm:$0xff] %v963_v3 }
 0x286   :  { %1031 = vst [vmem:[#allocation7 + $0x140] sm:$0xff] %v964_v7  ;;  %1032 = vst [vmem:[#allocation7 + $0x148] sm:$0xff] %v965_v51 }
 0x287   :  { %1033 = vst [vmem:[#allocation7 + $0x150] sm:$0xff] %v966_v37  ;;  %1034 = vst [vmem:[#allocation7 + $0x158] sm:$0xff] %v967_v45 }
 0x288   :  { %1035 = vst [vmem:[#allocation7 + $0x160] sm:$0xff] %v968_v52  ;;  %1036 = vst [vmem:[#allocation7 + $0x168] sm:$0xff] %v969_v61 }
 0x289   :  { %1037 = vst [vmem:[#allocation7 + $0x170] sm:$0xff] %v970_v6  ;;  %1038 = vst [vmem:[#allocation7 + $0x178] sm:$0xff] %v971_v17 }
 0x28a   :  { %1039 = vst [vmem:[#allocation7 + $0x180] sm:$0xff] %v972_v13  ;;  %1040 = vst [vmem:[#allocation7 + $0x188] sm:$0xff] %v973_v21 }
 0x28b   :  { %1041 = vst [vmem:[#allocation7 + $0x190] sm:$0xff] %v974_v1  ;;  %1042 = vst [vmem:[#allocation7 + $0x198] sm:$0xff] %v975_v30 }
 0x28c   :  { %1043 = vst [vmem:[#allocation7 + $0x1a0] sm:$0xff] %v976_v47  ;;  %1044 = vst [vmem:[#allocation7 + $0x1a8] sm:$0xff] %v977_v27 }
 0x28d   :  { %1045 = vst [vmem:[#allocation7 + $0x1b0] sm:$0xff] %v978_v25  ;;  %1046 = vst [vmem:[#allocation7 + $0x1b8] sm:$0xff] %v979_v38 }
 0x28e   :  { %1047 = vst [vmem:[#allocation7 + $0x1c0] sm:$0xff] %v980_v36  ;;  %1048 = vst [vmem:[#allocation7 + $0x1c8] sm:$0xff] %v981_v44 }
 0x28f   :  { %1049 = vst [vmem:[#allocation7 + $0x1d0] sm:$0xff] %v982_v55  ;;  %1050 = vst [vmem:[#allocation7 + $0x1d8] sm:$0xff] %v983_v19 }
 0x290   :  { %1051 = vst [vmem:[#allocation7 + $0x1e0] sm:$0xff] %v984_v48  ;;  %1052 = vst [vmem:[#allocation7 + $0x1e8] sm:$0xff] %v985_v9 }
 0x291   :  { %1053 = vst [vmem:[#allocation7 + $0x1f0] sm:$0xff] %v986_v60  ;;  %1054 = vst [vmem:[#allocation7 + $0x1f8] sm:$0xff] %v987_v4 }
 0x292   :  { %1055 = vst [vmem:[#allocation7 + $0x200] sm:$0xff] %v988_v62  ;;  %1057 = vst [vmem:[#allocation7 + $0x210] sm:$0xff] %v990_v42 }
 0x293   :  { %1398 = shalt.err (!%p1395_p6)
}
 0x294   :  { %s1399_s20 = scalar_lea.hbm %s2398_s4, 8960 }
 0x295   :  { %p1400_p7 = scmp.ne.s32.totalorder %s2398_s4, %s1399_s20  ;;  %p1403_p8 = scmp.lt.u32.totalorder %s1399_s20, %s2398_s4 }
 0x297   :  { %p1405_p9 = pnand %p1403_p8, %p1400_p7 }
 0x299   :  { %1408 = shalt.err (!%p1405_p9)
}
 0x29a   :  { %1072 = dma.vmem_to_hbm [thread:$0]  %s1067_s3, 8960, %s2398_s4, [#allocation4], %s1416_s25, %s1416_s25, %s1417_s26  }
 0x29b   :  { %1413 = dma.done.wait [#allocation4], 8960  }
 0x29c   :  { %1414 = vsyncadd [#allocation4], 4294958336 }
 0x29d   :  { %1076 = vsyncpa [#allocation3], 1 }
 0x29e   :  { %1077 = vsyncpa [#allocation6], 1 }
 0x29f   :  { %1078 = vsyncpa [#allocation4], 1 }

</bundles_post_ra>
